<compile_context>
chip_gen: v7x
topology: tpu7x:2x2x1
jax: 0.10.0
libtpu: 0.0.40
codegen_flags: <defaults>
</compile_context>

<pallas_src>
import functools
import math

import jax
import jax.numpy as jnp
from jax.experimental import pallas as pl
from jax.experimental.pallas import tpu as pltpu


# Contract the last (lane) dim of both operands: a @ b.T, keeps fc_w lane-dense.
_NT_DIMS = (((1,), (1,)), ((), ()))


# ------------------------------ fused kernel --------------------------------
def _blend_nbeats_kernel(x_ref, x1_ref, slab_ref, fcw_ref, out_ref,
                         bc_scr, h_scr, th_scr, *,
                         num_layers, units, theta2, batch, d_pad, classes):
    """Single-step kernel; all B*D_pad feature tokens live on the lane axis."""
    U, TT, C = units, theta2, classes
    n_tok = batch * d_pad
    rows_per_layer = 4 * U + TT + 8

    # Persistent ones rows fold every Linear bias into its matmul (extra K row).
    ones_row = jnp.ones((1, n_tok), jnp.float32)
    bc_scr[0:1] = x_ref[...]            # backcast, tokens on lanes
    bc_scr[1:2] = ones_row              # -> fc1 bias folded (K = 2)
    h_scr[U:U + 1] = ones_row           # -> fc2/3/4 + theta biases folded (K = U+1)
    th_scr[TT:TT + 1] = ones_row        # -> backcast/forecast biases folded (K = 2T+1)
    forecast = jnp.zeros((1, n_tok), jnp.float32)

    for l in range(num_layers):         # static unroll over generic blocks
        base = l * rows_per_layer
        # fc1: Linear(1 -> U), bias folded
        w1a = slab_ref[base:base + U, 0:2]                                   # (U, 2)
        h_scr[0:U] = jnp.maximum(
            jnp.dot(w1a, bc_scr[...], preferred_element_type=jnp.float32), 0.0)
        # fc2..fc4: Linear(U -> U), bias folded
        for blk in range(1, 4):
            wa = slab_ref[base + blk * U:base + (blk + 1) * U, 0:U + 1]      # (U, U+1)
            h_scr[0:U] = jnp.maximum(
                jnp.dot(wa, h_scr[...], preferred_element_type=jnp.float32), 0.0)
        # theta_b / theta_f fused into one (2T, U+1) dot
        wta = slab_ref[base + 4 * U:base + 4 * U + TT, 0:U + 1]              # (2T, U+1)
        th_scr[0:TT] = jnp.maximum(
            jnp.dot(wta, h_scr[...], preferred_element_type=jnp.float32), 0.0)
        # backcast_fc / forecast_fc packed into one (2, 2T+1) dot
        wbfa = slab_ref[base + 4 * U + TT:base + 4 * U + TT + 2, 0:TT + 1]   # (2, 2T+1)
        bf = jnp.dot(wbfa, th_scr[...], preferred_element_type=jnp.float32)  # (2, n_tok)
        bc_scr[0:1] = bc_scr[0:1] - bf[0:1]
        forecast = forecast + bf[1:2]

    # ---- Nbeats_beta final fc + BlendMLP head -------------------------------
    hb = num_layers * rows_per_layer
    fcb = slab_ref[hb:hb + 1, 0:C]                 # (1, C)
    bw1 = slab_ref[hb + 8:hb + 8 + C, 0:C]         # (C, C)
    bw2 = slab_ref[hb + 16:hb + 16 + C, 0:C]       # (C, C)
    bb = slab_ref[hb + 24:hb + 25, 0:C]            # (1, C)

    fc_relu = jnp.maximum(forecast, 0.0)           # (1, B*D_pad)
    # NOTE: lanes d in [D, D_pad) of each per-batch chunk carry finite garbage
    # propagated from the block biases; correctness relies on fcw_ref's padded
    # columns (d >= D) being zero. Never reduce forecast across full D_pad lanes.
    fc_rows = jnp.concatenate(
        [fc_relu[:, b * d_pad:(b + 1) * d_pad] for b in range(batch)], axis=0)  # (B, D_pad)
    x2 = jax.lax.dot_general(fc_rows, fcw_ref[...], _NT_DIMS,
                             preferred_element_type=jnp.float32) + fcb          # (B, C)

    # BlendMLP head: out = relu(cat(x1, x2)) @ blend_w + blend_b
    x1 = jnp.maximum(x1_ref[...], 0.0)
    x2 = jnp.maximum(x2, 0.0)
    out_ref[...] = (jnp.dot(x1, bw1, preferred_element_type=jnp.float32)
                    + jnp.dot(x2, bw2, preferred_element_type=jnp.float32)
                    + bb)


# ------------------------------ parameter packing ----------------------------
def pack_params(p, d_pad):
    """Pack all weights/biases into one lane-dense (R, 128) slab + (C, D_pad) fc_w."""
    L, U, _ = p['w2'].shape
    TT = p['wt'].shape[1]
    C = p['bb'].shape[-1]
    D = p['fc_w'].shape[0]
    assert U + 1 <= 128 and TT + 1 <= 128 and C <= 128

    rpl = 4 * U + TT + 8                       # rows per layer (8-aligned blocks)
    R = L * rpl + 32
    slab = jnp.zeros((R, 128), jnp.float32)
    for l in range(L):
        b0 = l * rpl
        slab = slab.at[b0:b0 + U, 0:1].set(p['w1'][l])
        slab = slab.at[b0:b0 + U, 1:2].set(p['b1'][l])
        for i, (wk, bk) in enumerate((('w2', 'b2'), ('w3', 'b3'), ('w4', 'b4')), 1):
            r = b0 + i * U
            slab = slab.at[r:r + U, 0:U].set(p[wk][l])
            slab = slab.at[r:r + U, U:U + 1].set(p[bk][l])
        r = b0 + 4 * U
        slab = slab.at[r:r + TT, 0:U].set(p['wt'][l])
        slab = slab.at[r:r + TT, U:U + 1].set(p['bt'][l])
        r = b0 + 4 * U + TT
        slab = slab.at[r:r + 2, 0:TT].set(p['wbf'][l])
        slab = slab.at[r:r + 2, TT:TT + 1].set(p['bbf'][l])
    hb = L * rpl
    slab = slab.at[hb:hb + 1, 0:C].set(p['fc_b'])
    slab = slab.at[hb + 8:hb + 8 + C, 0:C].set(p['bw1'])
    slab = slab.at[hb + 16:hb + 16 + C, 0:C].set(p['bw2'])
    slab = slab.at[hb + 24:hb + 25, 0:C].set(p['bb'])

    # fc_w stored lane-dense (C, D_pad); padded columns are ZERO (see kernel NOTE).
    fcw_t = jnp.zeros((C, d_pad), jnp.float32).at[:, 0:D].set(p['fc_w'].T)
    return slab, fcw_t


# ------------------------------ wrapper --------------------------------------
def blend_mlp_forward(x1, pca_features, params):
    """x1: (B, C) output of modelA (external).  pca_features: (B, D, 1)."""
    B, D, one = pca_features.shape
    assert one == 1
    L, U, _ = params['w2'].shape
    TT = params['wt'].shape[1]
    C = params['bb'].shape[-1]
    D_pad = pl.cdiv(D, 128) * 128
    N = B * D_pad

    x = pca_features.reshape(B, D).astype(jnp.float32)
    x = jnp.pad(x, ((0, 0), (0, D_pad - D))).reshape(1, N)     # all tokens on lanes
    x1f = x1.astype(jnp.float32)                               # (B, C)

    slab, fcw_t = pack_params(params, D_pad)

    per_tok = 2 * (U * 2 + 3 * U * (U + 1) + TT * (U + 1) + 2 * (TT + 1))
    flops = int(L * N * per_tok + B * (2 * C * D_pad + 4 * C * C))
    bytes_accessed = int(x.nbytes + x1f.nbytes + slab.nbytes + fcw_t.nbytes + B * C * 4)

    vmem = pl.BlockSpec(memory_space=pltpu.MemorySpace.VMEM)
    kernel = functools.partial(
        _blend_nbeats_kernel, num_layers=L, units=U, theta2=TT,
        batch=B, d_pad=D_pad, classes=C)

    out = pl.pallas_call(
        kernel,
        out_shape=jax.ShapeDtypeStruct((B, C), jnp.float32),
        in_specs=[vmem, vmem, vmem, vmem],
        out_specs=vmem,
        scratch_shapes=[pltpu.VMEM((2, N), jnp.float32),        # [backcast; ones]
                        pltpu.VMEM((U + 1, N), jnp.float32),    # [h; ones]
                        pltpu.VMEM((TT + 1, N), jnp.float32)],  # [theta; ones]
        cost_estimate=pl.CostEstimate(flops=flops, transcendentals=0,
                                      bytes_accessed=bytes_accessed),
    )(x, x1f, slab, fcw_t)
    return out


# ------------------------- parameters / reference ----------------------------
def init_params(key, L, U, T, D, C):
    # PyTorch nn.Linear default init: U(-1/sqrt(fan_in), 1/sqrt(fan_in)).
    keys = iter(jax.random.split(key, 40))

    def u(shape, fan_in):
        k = 1.0 / math.sqrt(fan_in)
        return jax.random.uniform(next(keys), shape, jnp.float32, -k, k)

    # N-Beats generic blocks (backcast_length = 1); weights stored (out, in) for
    # left-multiply against token-on-lanes activations, biases as column vectors.
    w1 = u((L, U, 1), 1);    b1 = u((L, U, 1), 1)
    w2 = u((L, U, U), U);    b2 = u((L, U, 1), U)
    w3 = u((L, U, U), U);    b3 = u((L, U, 1), U)
    w4 = u((L, U, U), U);    b4 = u((L, U, 1), U)
    wtb = u((L, T, U), U);   btb = u((L, T, 1), U)
    wtf = u((L, T, U), U);   btf = u((L, T, 1), U)
    wbc = u((L, 1, T), T);   bbc = u((L, 1, 1), T)
    wfc = u((L, 1, T), T);   bfc = u((L, 1, 1), T)

    # Fused theta projection and packed backcast/forecast heads.
    wt = jnp.concatenate([wtb, wtf], axis=1)                       # (L, 2T, U)
    bt = jnp.concatenate([btb, btf], axis=1)                       # (L, 2T, 1)
    z = jnp.zeros((L, 1, T), jnp.float32)
    wbf = jnp.concatenate([jnp.concatenate([wbc, z], axis=2),
                           jnp.concatenate([z, wfc], axis=2)], axis=1)   # (L, 2, 2T)
    bbf = jnp.concatenate([bbc, bfc], axis=1)                      # (L, 2, 1)

    # Nbeats_beta final fc (stored (in, out) for right-multiply).
    fc_w = u((D, C), D)
    fc_b = u((1, C), D)
    # BlendMLP Linear(2C -> C), stored (in, out) and split into x1 / x2 halves.
    bw = u((2 * C, C), 2 * C)
    bb = u((1, C), 2 * C)

    return dict(w1=w1, b1=b1, w2=w2, b2=b2, w3=w3, b3=b3, w4=w4, b4=b4,
                wt=wt, bt=bt, wbf=wbf, bbf=bbf,
                fc_w=fc_w, fc_b=fc_b,
                bw1=bw[:C], bw2=bw[C:], bb=bb)


def reference_forward(x1, pca_features, p, num_layers):
    bc = pca_features.astype(jnp.float32)                    # (B, D, 1)
    fc = jnp.zeros_like(bc)
    for l in range(num_layers):
        h = jax.nn.relu(bc @ p['w1'][l].T + p['b1'][l].T)
        h = jax.nn.relu(h @ p['w2'][l].T + p['b2'][l].T)
        h = jax.nn.relu(h @ p['w3'][l].T + p['b3'][l].T)
        h = jax.nn.relu(h @ p['w4'][l].T + p['b4'][l].T)
        th = jax.nn.relu(h @ p['wt'][l].T + p['bt'][l].T)    # (B, D, 2T)
        bf = th @ p['wbf'][l].T + p['bbf'][l].T              # (B, D, 2)
        bc = bc - bf[..., 0:1]
        fc = fc + bf[..., 1:2]
    x2 = jax.nn.relu(jnp.squeeze(fc, -1)) @ p['fc_w'] + p['fc_b']      # (B, C)
    cat = jnp.concatenate([x1, x2], axis=1)                            # (B, 2C)
    w = jnp.concatenate([p['bw1'], p['bw2']], axis=0)                  # (2C, C)
    return jax.nn.relu(cat) @ w + p['bb']


if __name__ == "__main__":
    # Hyper-parameters consistent with Nbeats_beta / BlendMLP at small scale.
    input_size = 1          # -> linea_multiplier = 1, internal input_size forced to 1
    num_classes = 5
    hidden_size = 32
    num_layers = 2          # nb_blocks_per_stack
    thetas_dim = 32
    B = 2

    lm = input_size if input_size <= 6 else 6
    D = input_size * lm + 363 * lm + lm     # 365: in_features of the Nbeats final fc

    key = jax.random.PRNGKey(0)
    pkey, xkey, akey = jax.random.split(key, 3)
    params = init_params(pkey, num_layers, hidden_size, thetas_dim, D, num_classes)
    pca_features = jax.random.normal(xkey, (B, D, 1), dtype=jnp.float32)
    # Placeholder for modelA(rr_x, rr_wavelets): (B, num_classes) logits.
    x1 = jax.random.normal(akey, (B, num_classes), dtype=jnp.float32)

    out = blend_mlp_forward(x1, pca_features, params)
    out = jax.block_until_ready(out)
    assert out.shape == (B, num_classes), out.shape

    ref = reference_forward(x1, pca_features, params, num_layers)
    if not jnp.allclose(out, ref, rtol=2e-2, atol=2e-2):
        raise AssertionError(
            f"mismatch vs reference: max abs err {jnp.max(jnp.abs(out - ref))}")

    print("KERNEL_OK")
</pallas_src>

<mosaic_0001>
module attributes {stable_mosaic.version = 11 : i64} {
  func.func @_blend_nbeats_kernel(%arg0: memref<1x768xf32, #tpu.memory_space<vmem>>, %arg1: memref<2x5xf32, #tpu.memory_space<vmem>>, %arg2: memref<432x128xf32, #tpu.memory_space<vmem>>, %arg3: memref<5x384xf32, #tpu.memory_space<vmem>>, %arg4: memref<2x5xf32, #tpu.memory_space<vmem>>, %arg5: memref<2x768xf32, #tpu.memory_space<vmem>>, %arg6: memref<33x768xf32, #tpu.memory_space<vmem>>, %arg7: memref<65x768xf32, #tpu.memory_space<vmem>>) attributes {dimension_semantics = [], scalar_prefetch = 0 : i64, scratch_operands = 3 : i64, tpu.core_type = #tpu.core_type<tc>} {
    %cst = arith.constant 1.000000e+00 : f32
    %0 = vector.broadcast %cst : f32 to vector<1x768xf32>
    %c0 = arith.constant 0 : index
    %c0_0 = arith.constant 0 : index
    %1 = vector.load %arg0[%c0, %c0_0] : memref<1x768xf32, #tpu.memory_space<vmem>>, vector<1x768xf32>
    %c0_1 = arith.constant 0 : index
    %c0_2 = arith.constant 0 : index
    %2 = vector.load %arg5[%c0_1, %c0_2] : memref<2x768xf32, #tpu.memory_space<vmem>>, vector<1x768xf32>
    tpu.vector_store %arg5[%c0_1, %c0_2], %1 {strides = array<i32>} : memref<2x768xf32, #tpu.memory_space<vmem>>, vector<1x768xf32>,
    %c1 = arith.constant 1 : index
    %c0_3 = arith.constant 0 : index
    %3 = vector.load %arg5[%c1, %c0_3] : memref<2x768xf32, #tpu.memory_space<vmem>>, vector<1x768xf32>
    tpu.vector_store %arg5[%c1, %c0_3], %0 {strides = array<i32>} : memref<2x768xf32, #tpu.memory_space<vmem>>, vector<1x768xf32>,
    %c32 = arith.constant 32 : index
    %c0_4 = arith.constant 0 : index
    %4 = vector.load %arg6[%c32, %c0_4] : memref<33x768xf32, #tpu.memory_space<vmem>>, vector<1x768xf32>
    tpu.vector_store %arg6[%c32, %c0_4], %0 {strides = array<i32>} : memref<33x768xf32, #tpu.memory_space<vmem>>, vector<1x768xf32>,
    %c64 = arith.constant 64 : index
    %c0_5 = arith.constant 0 : index
    %5 = vector.load %arg7[%c64, %c0_5] : memref<65x768xf32, #tpu.memory_space<vmem>>, vector<1x768xf32>
    tpu.vector_store %arg7[%c64, %c0_5], %0 {strides = array<i32>} : memref<65x768xf32, #tpu.memory_space<vmem>>, vector<1x768xf32>,
    %cst_6 = arith.constant 0.000000e+00 : f32
    %6 = vector.broadcast %cst_6 : f32 to vector<1x768xf32>
    %c0_7 = arith.constant 0 : index
    %c0_8 = arith.constant 0 : index
    %7 = vector.load %arg2[%c0_7, %c0_8] : memref<432x128xf32, #tpu.memory_space<vmem>>, vector<32x2xf32>
    %c0_9 = arith.constant 0 : index
    %c0_10 = arith.constant 0 : index
    %8 = vector.load %arg5[%c0_9, %c0_10] : memref<2x768xf32, #tpu.memory_space<vmem>>, vector<2x768xf32>
    %cst_11 = arith.constant dense<0.000000e+00> : vector<32x768xf32>
    %9 = tpu.matmul %7, %8, %cst_11 {dimension_numbers = #tpu.dot_dimension_numbers<[1], [0], [0], [1], [0, 0, 1, 1], [], []>} : vector<32x2xf32>, vector<2x768xf32>, vector<32x768xf32> -> vector<32x768xf32>
    %cst_12 = arith.constant 0.000000e+00 : f32
    %10 = vector.broadcast %cst_12 : f32 to vector<32x768xf32>
    %11 = arith.maximumf %9, %10 : vector<32x768xf32>
    %c0_13 = arith.constant 0 : index
    %c0_14 = arith.constant 0 : index
    %12 = vector.load %arg6[%c0_13, %c0_14] : memref<33x768xf32, #tpu.memory_space<vmem>>, vector<32x768xf32>
    tpu.vector_store %arg6[%c0_13, %c0_14], %11 {strides = array<i32>} : memref<33x768xf32, #tpu.memory_space<vmem>>, vector<32x768xf32>,
    %c32_15 = arith.constant 32 : index
    %c0_16 = arith.constant 0 : index
    %13 = vector.load %arg2[%c32_15, %c0_16] : memref<432x128xf32, #tpu.memory_space<vmem>>, vector<32x33xf32>
    %c0_17 = arith.constant 0 : index
    %c0_18 = arith.constant 0 : index
    %14 = vector.load %arg6[%c0_17, %c0_18] : memref<33x768xf32, #tpu.memory_space<vmem>>, vector<33x768xf32>
    %cst_19 = arith.constant dense<0.000000e+00> : vector<32x768xf32>
    %15 = tpu.matmul %13, %14, %cst_19 {dimension_numbers = #tpu.dot_dimension_numbers<[1], [0], [0], [1], [0, 0, 1, 1], [], []>} : vector<32x33xf32>, vector<33x768xf32>, vector<32x768xf32> -> vector<32x768xf32>
    %cst_20 = arith.constant 0.000000e+00 : f32
    %16 = vector.broadcast %cst_20 : f32 to vector<32x768xf32>
    %17 = arith.maximumf %15, %16 : vector<32x768xf32>
    %c0_21 = arith.constant 0 : index
    %c0_22 = arith.constant 0 : index
    %18 = vector.load %arg6[%c0_21, %c0_22] : memref<33x768xf32, #tpu.memory_space<vmem>>, vector<32x768xf32>
    tpu.vector_store %arg6[%c0_21, %c0_22], %17 {strides = array<i32>} : memref<33x768xf32, #tpu.memory_space<vmem>>, vector<32x768xf32>,
    %c64_23 = arith.constant 64 : index
    %c0_24 = arith.constant 0 : index
    %19 = vector.load %arg2[%c64_23, %c0_24] : memref<432x128xf32, #tpu.memory_space<vmem>>, vector<32x33xf32>
    %c0_25 = arith.constant 0 : index
    %c0_26 = arith.constant 0 : index
    %20 = vector.load %arg6[%c0_25, %c0_26] : memref<33x768xf32, #tpu.memory_space<vmem>>, vector<33x768xf32>
    %cst_27 = arith.constant dense<0.000000e+00> : vector<32x768xf32>
    %21 = tpu.matmul %19, %20, %cst_27 {dimension_numbers = #tpu.dot_dimension_numbers<[1], [0], [0], [1], [0, 0, 1, 1], [], []>} : vector<32x33xf32>, vector<33x768xf32>, vector<32x768xf32> -> vector<32x768xf32>
    %cst_28 = arith.constant 0.000000e+00 : f32
    %22 = vector.broadcast %cst_28 : f32 to vector<32x768xf32>
    %23 = arith.maximumf %21, %22 : vector<32x768xf32>
    %c0_29 = arith.constant 0 : index
    %c0_30 = arith.constant 0 : index
    %24 = vector.load %arg6[%c0_29, %c0_30] : memref<33x768xf32, #tpu.memory_space<vmem>>, vector<32x768xf32>
    tpu.vector_store %arg6[%c0_29, %c0_30], %23 {strides = array<i32>} : memref<33x768xf32, #tpu.memory_space<vmem>>, vector<32x768xf32>,
    %c96 = arith.constant 96 : index
    %c0_31 = arith.constant 0 : index
    %25 = vector.load %arg2[%c96, %c0_31] : memref<432x128xf32, #tpu.memory_space<vmem>>, vector<32x33xf32>
    %c0_32 = arith.constant 0 : index
    %c0_33 = arith.constant 0 : index
    %26 = vector.load %arg6[%c0_32, %c0_33] : memref<33x768xf32, #tpu.memory_space<vmem>>, vector<33x768xf32>
    %cst_34 = arith.constant dense<0.000000e+00> : vector<32x768xf32>
    %27 = tpu.matmul %25, %26, %cst_34 {dimension_numbers = #tpu.dot_dimension_numbers<[1], [0], [0], [1], [0, 0, 1, 1], [], []>} : vector<32x33xf32>, vector<33x768xf32>, vector<32x768xf32> -> vector<32x768xf32>
    %cst_35 = arith.constant 0.000000e+00 : f32
    %28 = vector.broadcast %cst_35 : f32 to vector<32x768xf32>
    %29 = arith.maximumf %27, %28 : vector<32x768xf32>
    %c0_36 = arith.constant 0 : index
    %c0_37 = arith.constant 0 : index
    %30 = vector.load %arg6[%c0_36, %c0_37] : memref<33x768xf32, #tpu.memory_space<vmem>>, vector<32x768xf32>
    tpu.vector_store %arg6[%c0_36, %c0_37], %29 {strides = array<i32>} : memref<33x768xf32, #tpu.memory_space<vmem>>, vector<32x768xf32>,
    %c128 = arith.constant 128 : index
    %c0_38 = arith.constant 0 : index
    %31 = vector.load %arg2[%c128, %c0_38] : memref<432x128xf32, #tpu.memory_space<vmem>>, vector<64x33xf32>
    %c0_39 = arith.constant 0 : index
    %c0_40 = arith.constant 0 : index
    %32 = vector.load %arg6[%c0_39, %c0_40] : memref<33x768xf32, #tpu.memory_space<vmem>>, vector<33x768xf32>
    %cst_41 = arith.constant dense<0.000000e+00> : vector<64x768xf32>
    %33 = tpu.matmul %31, %32, %cst_41 {dimension_numbers = #tpu.dot_dimension_numbers<[1], [0], [0], [1], [0, 0, 1, 1], [], []>} : vector<64x33xf32>, vector<33x768xf32>, vector<64x768xf32> -> vector<64x768xf32>
    %cst_42 = arith.constant 0.000000e+00 : f32
    %34 = vector.broadcast %cst_42 : f32 to vector<64x768xf32>
    %35 = arith.maximumf %33, %34 : vector<64x768xf32>
    %c0_43 = arith.constant 0 : index
    %c0_44 = arith.constant 0 : index
    %36 = vector.load %arg7[%c0_43, %c0_44] : memref<65x768xf32, #tpu.memory_space<vmem>>, vector<64x768xf32>
    tpu.vector_store %arg7[%c0_43, %c0_44], %35 {strides = array<i32>} : memref<65x768xf32, #tpu.memory_space<vmem>>, vector<64x768xf32>,
    %c192 = arith.constant 192 : index
    %c0_45 = arith.constant 0 : index
    %37 = vector.load %arg2[%c192, %c0_45] : memref<432x128xf32, #tpu.memory_space<vmem>>, vector<2x65xf32>
    %c0_46 = arith.constant 0 : index
    %c0_47 = arith.constant 0 : index
    %38 = vector.load %arg7[%c0_46, %c0_47] : memref<65x768xf32, #tpu.memory_space<vmem>>, vector<65x768xf32>
    %cst_48 = arith.constant dense<0.000000e+00> : vector<2x768xf32>
    %39 = tpu.matmul %37, %38, %cst_48 {dimension_numbers = #tpu.dot_dimension_numbers<[1], [0], [0], [1], [0, 0, 1, 1], [], []>} : vector<2x65xf32>, vector<65x768xf32>, vector<2x768xf32> -> vector<2x768xf32>
    %c0_49 = arith.constant 0 : index
    %c0_50 = arith.constant 0 : index
    %40 = vector.load %arg5[%c0_49, %c0_50] : memref<2x768xf32, #tpu.memory_space<vmem>>, vector<1x768xf32>
    %41 = vector.extract_strided_slice %39 {offsets = [0, 0], sizes = [1, 768], strides = [1, 1]} : vector<2x768xf32> to vector<1x768xf32>
    %42 = arith.subf %40, %41 : vector<1x768xf32>
    %c0_51 = arith.constant 0 : index
    %c0_52 = arith.constant 0 : index
    %43 = vector.load %arg5[%c0_51, %c0_52] : memref<2x768xf32, #tpu.memory_space<vmem>>, vector<1x768xf32>
    tpu.vector_store %arg5[%c0_51, %c0_52], %42 {strides = array<i32>} : memref<2x768xf32, #tpu.memory_space<vmem>>, vector<1x768xf32>,
    %44 = vector.extract_strided_slice %39 {offsets = [1, 0], sizes = [1, 768], strides = [1, 1]} : vector<2x768xf32> to vector<1x768xf32>
    %45 = arith.addf %6, %44 : vector<1x768xf32>
    %c200 = arith.constant 200 : index
    %c0_53 = arith.constant 0 : index
    %46 = vector.load %arg2[%c200, %c0_53] : memref<432x128xf32, #tpu.memory_space<vmem>>, vector<32x2xf32>
    %c0_54 = arith.constant 0 : index
    %c0_55 = arith.constant 0 : index
    %47 = vector.load %arg5[%c0_54, %c0_55] : memref<2x768xf32, #tpu.memory_space<vmem>>, vector<2x768xf32>
    %cst_56 = arith.constant dense<0.000000e+00> : vector<32x768xf32>
    %48 = tpu.matmul %46, %47, %cst_56 {dimension_numbers = #tpu.dot_dimension_numbers<[1], [0], [0], [1], [0, 0, 1, 1], [], []>} : vector<32x2xf32>, vector<2x768xf32>, vector<32x768xf32> -> vector<32x768xf32>
    %cst_57 = arith.constant 0.000000e+00 : f32
    %49 = vector.broadcast %cst_57 : f32 to vector<32x768xf32>
    %50 = arith.maximumf %48, %49 : vector<32x768xf32>
    %c0_58 = arith.constant 0 : index
    %c0_59 = arith.constant 0 : index
    %51 = vector.load %arg6[%c0_58, %c0_59] : memref<33x768xf32, #tpu.memory_space<vmem>>, vector<32x768xf32>
    tpu.vector_store %arg6[%c0_58, %c0_59], %50 {strides = array<i32>} : memref<33x768xf32, #tpu.memory_space<vmem>>, vector<32x768xf32>,
    %c232 = arith.constant 232 : index
    %c0_60 = arith.constant 0 : index
    %52 = vector.load %arg2[%c232, %c0_60] : memref<432x128xf32, #tpu.memory_space<vmem>>, vector<32x33xf32>
    %c0_61 = arith.constant 0 : index
    %c0_62 = arith.constant 0 : index
    %53 = vector.load %arg6[%c0_61, %c0_62] : memref<33x768xf32, #tpu.memory_space<vmem>>, vector<33x768xf32>
    %cst_63 = arith.constant dense<0.000000e+00> : vector<32x768xf32>
    %54 = tpu.matmul %52, %53, %cst_63 {dimension_numbers = #tpu.dot_dimension_numbers<[1], [0], [0], [1], [0, 0, 1, 1], [], []>} : vector<32x33xf32>, vector<33x768xf32>, vector<32x768xf32> -> vector<32x768xf32>
    %cst_64 = arith.constant 0.000000e+00 : f32
    %55 = vector.broadcast %cst_64 : f32 to vector<32x768xf32>
    %56 = arith.maximumf %54, %55 : vector<32x768xf32>
    %c0_65 = arith.constant 0 : index
    %c0_66 = arith.constant 0 : index
    %57 = vector.load %arg6[%c0_65, %c0_66] : memref<33x768xf32, #tpu.memory_space<vmem>>, vector<32x768xf32>
    tpu.vector_store %arg6[%c0_65, %c0_66], %56 {strides = array<i32>} : memref<33x768xf32, #tpu.memory_space<vmem>>, vector<32x768xf32>,
    %c264 = arith.constant 264 : index
    %c0_67 = arith.constant 0 : index
    %58 = vector.load %arg2[%c264, %c0_67] : memref<432x128xf32, #tpu.memory_space<vmem>>, vector<32x33xf32>
    %c0_68 = arith.constant 0 : index
    %c0_69 = arith.constant 0 : index
    %59 = vector.load %arg6[%c0_68, %c0_69] : memref<33x768xf32, #tpu.memory_space<vmem>>, vector<33x768xf32>
    %cst_70 = arith.constant dense<0.000000e+00> : vector<32x768xf32>
    %60 = tpu.matmul %58, %59, %cst_70 {dimension_numbers = #tpu.dot_dimension_numbers<[1], [0], [0], [1], [0, 0, 1, 1], [], []>} : vector<32x33xf32>, vector<33x768xf32>, vector<32x768xf32> -> vector<32x768xf32>
    %cst_71 = arith.constant 0.000000e+00 : f32
    %61 = vector.broadcast %cst_71 : f32 to vector<32x768xf32>
    %62 = arith.maximumf %60, %61 : vector<32x768xf32>
    %c0_72 = arith.constant 0 : index
    %c0_73 = arith.constant 0 : index
    %63 = vector.load %arg6[%c0_72, %c0_73] : memref<33x768xf32, #tpu.memory_space<vmem>>, vector<32x768xf32>
    tpu.vector_store %arg6[%c0_72, %c0_73], %62 {strides = array<i32>} : memref<33x768xf32, #tpu.memory_space<vmem>>, vector<32x768xf32>,
    %c296 = arith.constant 296 : index
    %c0_74 = arith.constant 0 : index
    %64 = vector.load %arg2[%c296, %c0_74] : memref<432x128xf32, #tpu.memory_space<vmem>>, vector<32x33xf32>
    %c0_75 = arith.constant 0 : index
    %c0_76 = arith.constant 0 : index
    %65 = vector.load %arg6[%c0_75, %c0_76] : memref<33x768xf32, #tpu.memory_space<vmem>>, vector<33x768xf32>
    %cst_77 = arith.constant dense<0.000000e+00> : vector<32x768xf32>
    %66 = tpu.matmul %64, %65, %cst_77 {dimension_numbers = #tpu.dot_dimension_numbers<[1], [0], [0], [1], [0, 0, 1, 1], [], []>} : vector<32x33xf32>, vector<33x768xf32>, vector<32x768xf32> -> vector<32x768xf32>
    %cst_78 = arith.constant 0.000000e+00 : f32
    %67 = vector.broadcast %cst_78 : f32 to vector<32x768xf32>
    %68 = arith.maximumf %66, %67 : vector<32x768xf32>
    %c0_79 = arith.constant 0 : index
    %c0_80 = arith.constant 0 : index
    %69 = vector.load %arg6[%c0_79, %c0_80] : memref<33x768xf32, #tpu.memory_space<vmem>>, vector<32x768xf32>
    tpu.vector_store %arg6[%c0_79, %c0_80], %68 {strides = array<i32>} : memref<33x768xf32, #tpu.memory_space<vmem>>, vector<32x768xf32>,
    %c328 = arith.constant 328 : index
    %c0_81 = arith.constant 0 : index
    %70 = vector.load %arg2[%c328, %c0_81] : memref<432x128xf32, #tpu.memory_space<vmem>>, vector<64x33xf32>
    %c0_82 = arith.constant 0 : index
    %c0_83 = arith.constant 0 : index
    %71 = vector.load %arg6[%c0_82, %c0_83] : memref<33x768xf32, #tpu.memory_space<vmem>>, vector<33x768xf32>
    %cst_84 = arith.constant dense<0.000000e+00> : vector<64x768xf32>
    %72 = tpu.matmul %70, %71, %cst_84 {dimension_numbers = #tpu.dot_dimension_numbers<[1], [0], [0], [1], [0, 0, 1, 1], [], []>} : vector<64x33xf32>, vector<33x768xf32>, vector<64x768xf32> -> vector<64x768xf32>
    %cst_85 = arith.constant 0.000000e+00 : f32
    %73 = vector.broadcast %cst_85 : f32 to vector<64x768xf32>
    %74 = arith.maximumf %72, %73 : vector<64x768xf32>
    %c0_86 = arith.constant 0 : index
    %c0_87 = arith.constant 0 : index
    %75 = vector.load %arg7[%c0_86, %c0_87] : memref<65x768xf32, #tpu.memory_space<vmem>>, vector<64x768xf32>
    tpu.vector_store %arg7[%c0_86, %c0_87], %74 {strides = array<i32>} : memref<65x768xf32, #tpu.memory_space<vmem>>, vector<64x768xf32>,
    %c392 = arith.constant 392 : index
    %c0_88 = arith.constant 0 : index
    %76 = vector.load %arg2[%c392, %c0_88] : memref<432x128xf32, #tpu.memory_space<vmem>>, vector<2x65xf32>
    %c0_89 = arith.constant 0 : index
    %c0_90 = arith.constant 0 : index
    %77 = vector.load %arg7[%c0_89, %c0_90] : memref<65x768xf32, #tpu.memory_space<vmem>>, vector<65x768xf32>
    %cst_91 = arith.constant dense<0.000000e+00> : vector<2x768xf32>
    %78 = tpu.matmul %76, %77, %cst_91 {dimension_numbers = #tpu.dot_dimension_numbers<[1], [0], [0], [1], [0, 0, 1, 1], [], []>} : vector<2x65xf32>, vector<65x768xf32>, vector<2x768xf32> -> vector<2x768xf32>
    %c0_92 = arith.constant 0 : index
    %c0_93 = arith.constant 0 : index
    %79 = vector.load %arg5[%c0_92, %c0_93] : memref<2x768xf32, #tpu.memory_space<vmem>>, vector<1x768xf32>
    %80 = vector.extract_strided_slice %78 {offsets = [0, 0], sizes = [1, 768], strides = [1, 1]} : vector<2x768xf32> to vector<1x768xf32>
    %81 = arith.subf %79, %80 : vector<1x768xf32>
    %c0_94 = arith.constant 0 : index
    %c0_95 = arith.constant 0 : index
    %82 = vector.load %arg5[%c0_94, %c0_95] : memref<2x768xf32, #tpu.memory_space<vmem>>, vector<1x768xf32>
    tpu.vector_store %arg5[%c0_94, %c0_95], %81 {strides = array<i32>} : memref<2x768xf32, #tpu.memory_space<vmem>>, vector<1x768xf32>,
    %83 = vector.extract_strided_slice %78 {offsets = [1, 0], sizes = [1, 768], strides = [1, 1]} : vector<2x768xf32> to vector<1x768xf32>
    %84 = arith.addf %45, %83 : vector<1x768xf32>
    %c400 = arith.constant 400 : index
    %c0_96 = arith.constant 0 : index
    %85 = vector.load %arg2[%c400, %c0_96] : memref<432x128xf32, #tpu.memory_space<vmem>>, vector<1x5xf32>
    %c408 = arith.constant 408 : index
    %c0_97 = arith.constant 0 : index
    %86 = vector.load %arg2[%c408, %c0_97] : memref<432x128xf32, #tpu.memory_space<vmem>>, vector<5x5xf32>
    %c416 = arith.constant 416 : index
    %c0_98 = arith.constant 0 : index
    %87 = vector.load %arg2[%c416, %c0_98] : memref<432x128xf32, #tpu.memory_space<vmem>>, vector<5x5xf32>
    %c424 = arith.constant 424 : index
    %c0_99 = arith.constant 0 : index
    %88 = vector.load %arg2[%c424, %c0_99] : memref<432x128xf32, #tpu.memory_space<vmem>>, vector<1x5xf32>
    %cst_100 = arith.constant 0.000000e+00 : f32
    %89 = vector.broadcast %cst_100 : f32 to vector<1x768xf32>
    %90 = arith.maximumf %84, %89 : vector<1x768xf32>
    %91 = vector.extract_strided_slice %90 {offsets = [0, 0], sizes = [1, 384], strides = [1, 1]} : vector<1x768xf32> to vector<1x384xf32>
    %92 = vector.extract_strided_slice %90 {offsets = [0, 384], sizes = [1, 384], strides = [1, 1]} : vector<1x768xf32> to vector<1x384xf32>
    %93 = tpu.concatenate %91, %92 in 0 : vector<1x384xf32>, vector<1x384xf32> -> vector<2x384xf32>
    %c0_101 = arith.constant 0 : index
    %c0_102 = arith.constant 0 : index
    %94 = vector.load %arg3[%c0_101, %c0_102] : memref<5x384xf32, #tpu.memory_space<vmem>>, vector<5x384xf32>
    %cst_103 = arith.constant dense<0.000000e+00> : vector<2x5xf32>
    %95 = tpu.matmul %93, %94, %cst_103 {dimension_numbers = #tpu.dot_dimension_numbers<[1], [1], [0], [0], [0, 0, 1, 0], [], []>} : vector<2x384xf32>, vector<5x384xf32>, vector<2x5xf32> -> vector<2x5xf32>
    %96 = vector.broadcast %85 : vector<1x5xf32> to vector<2x5xf32>
    %97 = arith.addf %95, %96 : vector<2x5xf32>
    %c0_104 = arith.constant 0 : index
    %c0_105 = arith.constant 0 : index
    %98 = vector.load %arg1[%c0_104, %c0_105] : memref<2x5xf32, #tpu.memory_space<vmem>>, vector<2x5xf32>
    %cst_106 = arith.constant 0.000000e+00 : f32
    %99 = vector.broadcast %cst_106 : f32 to vector<2x5xf32>
    %100 = arith.maximumf %98, %99 : vector<2x5xf32>
    %cst_107 = arith.constant 0.000000e+00 : f32
    %101 = vector.broadcast %cst_107 : f32 to vector<2x5xf32>
    %102 = arith.maximumf %97, %101 : vector<2x5xf32>
    %cst_108 = arith.constant dense<0.000000e+00> : vector<2x5xf32>
    %103 = tpu.matmul %100, %86, %cst_108 {dimension_numbers = #tpu.dot_dimension_numbers<[1], [0], [0], [1], [0, 0, 1, 1], [], []>} : vector<2x5xf32>, vector<5x5xf32>, vector<2x5xf32> -> vector<2x5xf32>
    %cst_109 = arith.constant dense<0.000000e+00> : vector<2x5xf32>
    %104 = tpu.matmul %102, %87, %cst_109 {dimension_numbers = #tpu.dot_dimension_numbers<[1], [0], [0], [1], [0, 0, 1, 1], [], []>} : vector<2x5xf32>, vector<5x5xf32>, vector<2x5xf32> -> vector<2x5xf32>
    %105 = arith.addf %103, %104 : vector<2x5xf32>
    %106 = vector.broadcast %88 : vector<1x5xf32> to vector<2x5xf32>
    %107 = arith.addf %105, %106 : vector<2x5xf32>
    %c0_110 = arith.constant 0 : index
    %c0_111 = arith.constant 0 : index
    %108 = vector.load %arg4[%c0_110, %c0_111] : memref<2x5xf32, #tpu.memory_space<vmem>>, vector<2x5xf32>
    tpu.vector_store %arg4[%c0_110, %c0_111], %107 {strides = array<i32>} : memref<2x5xf32, #tpu.memory_space<vmem>>, vector<2x5xf32>,
    return
  }
}

</mosaic_0001>

<bundles_post_ra>
// kernel: tpu_custom_call.1
= control target key start
LH: loop header
LB: loop body
LE: loop exit
PB: predicated region body
PF: predicated region fallthrough
CT: control target
= control target key end

     0   :  { %9 = vsyncpa [#allocation6], 0  ;;  %s6383_s0 = inlined_call_operand.hbm [shape: f32[1,768], index: 0, kind: input, shape index: {}]   ;;  %s6384_s1 = inlined_call_operand.vmem [shape: f32[2,5], index: 1, kind: input, shape index: {}]   ;;  %s6385_s2 = inlined_call_operand.hbm [shape: f32[432,128], index: 2, kind: input, shape index: {}]   ;;  %s6386_s3 = inlined_call_operand.hbm [shape: f32[5,384], index: 3, kind: input, shape index: {}]   ;;  %s6387_s4 = inlined_call_operand.hbm [shape: f32[2,5], index: 4, kind: output, shape index: {}]  }
   0x1   :  { %10 = vsyncpa [#allocation9], 0 }
   0x2   :  { %11 = vsyncpa [#allocation7], 0  ;;  %s5810_s15 = smov [#allocation8]   ;;  %s5716_s19 = scalar_lea.hbm %s6385_s2, 6912 }
   0x3   :  { %s29_s16 = sshll.u32 %s5810_s15, 4  ;;  %p5717_p0 = scmp.ne.s32.totalorder %s6385_s2, %s5716_s19  ;;  %s30_s16 = int_to_ptr.vmem [resolvable:$true] %s29_s16 }
   0x4   :  { %p5720_p1 = scmp.lt.u32.totalorder %s5716_s19, %s6385_s2 }
   0x6   :  { %p5722_p2 = pnand %p5720_p1, %p5717_p0 }
   0x8   :  { %5725 = shalt.err (!%p5722_p2)
}
   0x9   :  { %s5726_s24 = scalar_lea.vmem %s30_s16, 6912  ;;  %p5731_p4 = scmp.lt.s32.totalorder %s30_s16, %s30_s16 }
   0xa   :  { %p5727_p3 = scmp.ne.s32.totalorder %s30_s16, %s5726_s24  ;;  %p5732_p5 = scmp.lt.s32.totalorder %s5726_s24, %s5726_s24 }
   0xc   :  { %p5733_p6 = por %p5732_p5, %p5731_p4 }
   0xe   :  { %p5734_p7 = pnand %p5733_p6, %p5727_p3 }
  0x10   :  { %5737 = shalt.err (!%p5734_p7)
}
  0x11   :  { %s5811_s25 = smov 128   ;;  %s5812_s26 = smov 8  }
  0x12   :  { %35 = dma.hbm_to_vmem [thread:$0]  %s6385_s2, 6912, %s30_s16, [#allocation9], %s5811_s25, %s5811_s25, %s5812_s26  }
  0x13   :  { %s5813_s29 = smov [#allocation5]   ;;  %s5814_s5 = smov [#allocation10]  }
  0x14   :  { %s18_s30 = sshll.u32 %s5813_s29, 4  ;;  %s42_s6 = sshll.u32 %s5814_s5, 4  ;;  %s19_s30 = int_to_ptr.vmem [resolvable:$true] %s18_s30  ;;  %s43_s6 = int_to_ptr.vmem [resolvable:$true] %s42_s6 }
  0x15   :  { %s5738_s9 = scalar_lea.hbm %s6383_s0, 96 }
  0x16   :  { %p5739_p8 = scmp.ne.s32.totalorder %s6383_s0, %s5738_s9  ;;  %p5742_p9 = scmp.lt.u32.totalorder %s5738_s9, %s6383_s0 }
  0x18   :  { %p5744_p10 = pnand %p5742_p9, %p5739_p8 }
  0x1a   :  { %5747 = shalt.err (!%p5744_p10)
}
  0x1b   :  { %s5748_s2 = scalar_lea.vmem %s19_s30, 96  ;;  %p5753_p12 = scmp.lt.s32.totalorder %s19_s30, %s19_s30 }
  0x1c   :  { %p5749_p11 = scmp.ne.s32.totalorder %s19_s30, %s5748_s2  ;;  %p5754_p13 = scmp.lt.s32.totalorder %s5748_s2, %s5748_s2 }
  0x1e   :  { %p5755_p0 = por %p5754_p13, %p5753_p12 }
  0x20   :  { %p5756_p1 = pnand %p5755_p0, %p5749_p11 }
  0x22   :  { %5759 = shalt.err (!%p5756_p1)
}
  0x23   :  { %21 = dma.hbm_to_vmem [thread:$0]  %s6383_s0, 96, %s19_s30, [#allocation6]  }
  0x24   :  { %s5760_s18 = scalar_lea.hbm %s6386_s3, 384 }
  0x25   :  { %p5761_p2 = scmp.ne.s32.totalorder %s6386_s3, %s5760_s18  ;;  %p5764_p3 = scmp.lt.u32.totalorder %s5760_s18, %s6386_s3 }
  0x27   :  { %p5766_p4 = pnand %p5764_p3, %p5761_p2 }
  0x29   :  { %5769 = shalt.err (!%p5766_p4)
}
  0x2a   :  { %s5770_s23 = scalar_lea.vmem %s43_s6, 384  ;;  %p5775_p6 = scmp.lt.s32.totalorder %s43_s6, %s43_s6 }
  0x2b   :  { %p5771_p5 = scmp.ne.s32.totalorder %s43_s6, %s5770_s23  ;;  %p5776_p7 = scmp.lt.s32.totalorder %s5770_s23, %s5770_s23 }
  0x2d   :  { %p5777_p8 = por %p5776_p7, %p5775_p6 }
  0x2f   :  { %p5778_p9 = pnand %p5777_p8, %p5771_p5 }
  0x31   :  { %5781 = shalt.err (!%p5778_p9)
}
  0x32   :  { %45 = dma.hbm_to_vmem [thread:$0]  %s6386_s3, 384, %s43_s6, [#allocation9]  }
  0x33   :  { %5804 = dma.done.wait [#allocation6], 96  }
  0x34   :  { %5805 = vsyncadd [#allocation6], 4294967200 }
  0x35   :  { %5806 = dma.done.wait [#allocation9], 7296  }
  0x36   :  { %5807 = vsyncadd [#allocation9], 4294960000  ;;  %v56_v0 = vlaneseq  ;;  %v5815_v2 = vmov 0.0   ;;  %v5816_v3 = vmov 1.0   ;;  %v5817_v4 = vmov 1983009808  }
  0x37   :  { %192 = vmatprep.mubr.f32.mxu0 %v5815_v2  ;;  %281 = vmatprep.mubr.f32.mxu1 %v5815_v2  ;;  %v79_v5 = vunpack.c.l.s4 %v5817_v4  ;;  %v55_v6 = vld [vmem:[#allocation5] sm:$0x3f]  ;;  %vm115_vm1 = vcmask 1041408   ;;  %v69_v17 = vld [vmem:[#allocation8] sm:$0xff]  ;;  %vm102_vm2 = vcmask 15360   ;;  %v70_v19 = vld [vmem:[#allocation8 + $0x8] sm:$0xff] }
  0x38   :  { %vm5882_vm0 = vcmp.lt.s32.totalorder %v56_v0, 768  ;;  %v5900_v8 = vshrl.u32 %v56_v0, 7  ;;  %v71_v20 = vld [vmem:[#allocation8 + $0x10] sm:$0xff]  ;;  %v72_v21 = vld [vmem:[#allocation8 + $0x18] sm:$0xff]  ;;  %vm490_vm3 = vcmask 1040384   ;;  %vm477_vm4 = vcmask 269312  }
  0x39   :  { %62 = vst.msk [vmem:[#allocation2 + $0x1] ss:$2 sm:$0x3f] %vm5882_vm0, %v5816_v3  ;;  %64 = vst.msk [vmem:[#allocation3 + $0xc0] ss:$8 sm:$0xf] %vm5882_vm0, %v5816_v3  ;;  %v80_v7 = vunpack.c.0.s8 %v79_v5 }
  0x3a   :  { %65 = vst.msk [vmem:[#allocation3 + $0xc0] ss:$8 sm:$0x30] %vm5882_vm0, %v5816_v3  ;;  %67 = vst.msk [vmem:[#allocation4 + $0x180] ss:$8 sm:$0xf] %vm5882_vm0, %v5816_v3 }
  0x3b   :  { %68 = vst.msk [vmem:[#allocation4 + $0x180] ss:$8 sm:$0x30] %vm5882_vm0, %v5816_v3  ;;  %60 = vst.msk [vmem:[#allocation2] ss:$2 sm:$0x3f] %vm5882_vm0, %v55_v6  ;;  %v5903_v9 = vsub.s32 %v80_v7, %v5900_v8 }
  0x3c   :  { %vm2152_vm5 = vcmask 531456   ;;  %vm5819_vm6 = vmmov 0   ;;  %vm4988_vm7 = vcmask 1044480   ;;  %vm4984_vm8 = vcmask 39936   ;;  %s5820_s26 = smov [#allocation11]  }
  0x3d   :  { %s5151_s27 = sshll.u32 %s5820_s26, 4  ;;  %vm5143_vm9 = vcmask 33792   ;;  %s5152_s27 = int_to_ptr.vmem [resolvable:$true] %s5151_s27 }
  0x3e   :  { %p5787_p11 = scmp.lt.s32.totalorder %s5152_s27, %s5152_s27 }
  0x40   :  { %v472_v60 = vld [vmem:[#allocation3 + $0xc8] sm:$0x1]  ;;  %v471_v5 = vld [vmem:[#allocation3 + $0xc0] sm:$0x1] }
  0x42   :  { %v73_v10 = vld [vmem:[#allocation2] sm:$0xff]  ;;  %v5161_v11 = vld.sshfl [vmem:[#allocation2 + $0x8] sm:$0x33 pattern:$0x76325410] }
  0x43   :  { %v84_v12 = vrot.slane %v73_v10, %v5903_v9  ;;  %v77_v13 = vcombine.high %v73_v10, %v73_v10  ;;  %v101_v15 = vcombine.high %v5161_v11, %v5161_v11 }
  0x45   :  { %v92_v14 = vcombine.high %v84_v12, %v84_v12  ;;  %v91_v16 = vrot.slane %v77_v13, %v5903_v9 }
  0x47   :  { %5162 = vmatprep.subr.msk.mxu0 %vm115_vm1, %v92_v14  ;;  %v93_v18 = vcombine.high %v91_v16, %v91_v16 }
  0x48   :  { %5163 = vmatpush1.msk.msra.mxu0 %vm115_vm1, %v84_v12  ;;  %v474_v12 = vld [vmem:[#allocation3 + $0xd8] sm:$0x1] }
  0x49   :  { %5164 = vmatmul.mubr.msk.f32.vlgmr.msra.gmra.mrb[0].mxu0 %vm102_vm2, %v69_v17  ;;  %5174 = vmatprep.subr.msk.mxu0 %vm115_vm1, %v101_v15 }
  0x4a   :  { %198 = vmatprep.mubr.f32.mxu0 %v5815_v2  ;;  %5175 = vmatpush1.msk.msra.mxu0 %vm115_vm1, %v5161_v11  ;;  %v443_v11 = vld [vmem:[#allocation8 + $0x20] sm:$0xff] }
  0x4b   :  { %5168 = vmatprep.subr.msk.mxu1 %vm115_vm1, %v93_v18 }
  0x4c   :  { %5169 = vmatpush1.msk.msra.mxu1 %vm115_vm1, %v91_v16 }
  0x4d   :  { %5165 = vmatmul.mubr.msk.f32.gmra.mrb[2].mxu0 %vm102_vm2, %v70_v19  ;;  %5170 = vmatmul.mubr.msk.f32.vlgmr.msra.gmra.mrb[0].mxu1 %vm102_vm2, %v69_v17 }
  0x4e   :  { %204 = vmatprep.mubr.f32.mxu0 %v5815_v2  ;;  %287 = vmatprep.mubr.f32.mxu1 %v5815_v2 }
  0x51   :  { %5166 = vmatmul.mubr.msk.f32.gmra.mrb[4].mxu0 %vm102_vm2, %v71_v20  ;;  %5171 = vmatmul.mubr.msk.f32.gmra.mrb[2].mxu1 %vm102_vm2, %v70_v19 }
  0x52   :  { %210 = vmatprep.mubr.f32.mxu0 %v5815_v2  ;;  %293 = vmatprep.mubr.f32.mxu1 %v5815_v2 }
  0x55   :  { %5167 = vmatmul.mubr.msk.f32.gmra.mrb[6].mxu0 %vm102_vm2, %v72_v21  ;;  %5172 = vmatmul.mubr.msk.f32.gmra.mrb[4].mxu1 %vm102_vm2, %v71_v20 }
  0x56   :  { %370 = vmatprep.mubr.f32.mxu0 %v5815_v2  ;;  %299 = vmatprep.mubr.f32.mxu1 %v5815_v2 }
  0x59   :  { %5176 = vmatmul.mubr.msk.f32.vlgmr.msra.gmra.mrb[8].mxu0 %vm102_vm2, %v69_v17  ;;  %5173 = vmatmul.mubr.msk.f32.gmra.mrb[6].mxu1 %vm102_vm2, %v72_v21  ;;  %v473_v17 = vld [vmem:[#allocation3 + $0xd0] sm:$0x1] }
  0x5a   :  { %376 = vmatprep.mubr.f32.mxu0 %v5815_v2  ;;  %573 = vmatprep.mubr.f32.mxu1 %v5815_v2 }
  0x5d   :  { %5177 = vmatmul.mubr.msk.f32.gmra.mrb[10].mxu0 %vm102_vm2, %v70_v19  ;;  %v444_v19 = vld [vmem:[#allocation8 + $0x28] sm:$0xff] }
  0x5e   :  { %382 = vmatprep.mubr.f32.mxu0 %v5815_v2 }
  0x61   :  { %5178 = vmatmul.mubr.msk.f32.gmra.mrb[12].mxu0 %vm102_vm2, %v71_v20 }
  0x62   :  { %388 = vmatprep.mubr.f32.mxu0 %v5815_v2 }
  0x65   :  { %5179 = vmatmul.mubr.msk.f32.gmra.mrb[14].mxu0 %vm102_vm2, %v72_v21 }
  0x66   :  { %662 = vmatprep.mubr.f32.mxu0 %v5815_v2 }
 0x11c   :  { %v194_v22 = vpop.f32.mrb[0].mxu0 }
 0x11d   :  { %v196_v23 = vpop.f32.mrb[1].mxu0  ;;  %v395_v26 = vmax.f32 %v194_v22, 0.0 }
 0x11e   :  { %v396_v30 = vmax.f32 %v196_v23, 0.0 }
 0x120   :  { %v200_v24 = vpop.f32.mrb[2].mxu0  ;;  %v283_v25 = vpop.f32.mrb[0].mxu1 }
 0x121   :  { %v401_v27 = vmax.f32 %v200_v24, 0.0  ;;  %v202_v28 = vpop.f32.mrb[3].mxu0  ;;  %v285_v29 = vpop.f32.mrb[1].mxu1  ;;  %v397_v33 = vmax.f32 %v283_v25, 0.0  ;;  %v445_v25 = vld [vmem:[#allocation8 + $0x30] sm:$0xff] }
 0x122   :  { %v402_v31 = vmax.f32 %v202_v28, 0.0  ;;  %v398_v36 = vmax.f32 %v285_v29, 0.0  ;;  %v446_v29 = vld [vmem:[#allocation8 + $0x38] sm:$0xff] }
 0x123   :  { %v5414_v32 = vpack.c.bf16 %v401_v27, %v395_v26 }
 0x124   :  { %v206_v34 = vpop.f32.mrb[4].mxu0  ;;  %v5412_v35 = vpack.c.bf16 %v402_v31, %v396_v30  ;;  %v289_v37 = vpop.f32.mrb[2].mxu1  ;;  %v476_v30 = vld [vmem:[#allocation3 + $0xe8] sm:$0x1]  ;;  %v475_v31 = vld [vmem:[#allocation3 + $0xe0] sm:$0x1] }
 0x125   :  { %v208_v38 = vpop.f32.mrb[5].mxu0  ;;  %v403_v39 = vmax.f32 %v289_v37, 0.0  ;;  %v291_v40 = vpop.f32.mrb[3].mxu1  ;;  %v407_v46 = vmax.f32 %v206_v34, 0.0 }
 0x126   :  { %5413 = vmatprep.subr.bf16.mxu1 %v5412_v35  ;;  %v404_v41 = vmax.f32 %v291_v40, 0.0  ;;  %v408_v50 = vmax.f32 %v208_v38, 0.0 }
 0x127   :  { %5415 = vmatpush1.bf16.msra.mxu1 %v5414_v32  ;;  %v5422_v42 = vpack.c.bf16 %v403_v39, %v397_v33 }
 0x128   :  { %v212_v43 = vpop.f32.mrb[6].mxu0  ;;  %v295_v44 = vpop.f32.mrb[4].mxu1  ;;  %v5420_v45 = vpack.c.bf16 %v404_v41, %v398_v36 }
 0x129   :  { %v413_v47 = vmax.f32 %v212_v43, 0.0  ;;  %v214_v48 = vpop.f32.mrb[7].mxu0  ;;  %v297_v49 = vpop.f32.mrb[5].mxu1  ;;  %v409_v53 = vmax.f32 %v295_v44, 0.0 }
 0x12a   :  { %v414_v51 = vmax.f32 %v214_v48, 0.0  ;;  %5421 = vmatprep.subr.bf16.mxu0 %v5420_v45  ;;  %v410_v56 = vmax.f32 %v297_v49, 0.0 }
 0x12b   :  { %v5418_v52 = vpack.c.bf16 %v413_v47, %v407_v46  ;;  %5423 = vmatpush1.bf16.msra.mxu0 %v5422_v42 }
 0x12c   :  { %v372_v54 = vpop.f32.mrb[8].mxu0  ;;  %v5416_v55 = vpack.c.bf16 %v414_v51, %v408_v50  ;;  %v301_v57 = vpop.f32.mrb[6].mxu1 }
 0x12d   :  { %v374_v58 = vpop.f32.mrb[9].mxu0  ;;  %v415_v59 = vmax.f32 %v301_v57, 0.0  ;;  %v303_v61 = vpop.f32.mrb[7].mxu1  ;;  %v399_v63 = vmax.f32 %v372_v54, 0.0 }
 0x12e   :  { %5417 = vmatprep.subr.bf16.mxu1 %v5416_v55  ;;  %v416_v62 = vmax.f32 %v303_v61, 0.0  ;;  %v400_v3 = vmax.f32 %v374_v58, 0.0 }
 0x12f   :  { %5419 = vmatpush1.bf16.msra.mxu1 %v5418_v52  ;;  %v5426_v0 = vpack.c.bf16 %v415_v59, %v409_v53 }
 0x130   :  { %v378_v4 = vpop.f32.mrb[10].mxu0  ;;  %5180 = vmatprep.subr.msk.mxu1 %vm490_vm3, %v472_v60  ;;  %v5424_v6 = vpack.c.bf16 %v416_v62, %v410_v56 }
 0x131   :  { %v405_v7 = vmax.f32 %v378_v4, 0.0  ;;  %v380_v10 = vpop.f32.mrb[11].mxu0 }
 0x132   :  { %v406_v13 = vmax.f32 %v380_v10, 0.0  ;;  %5425 = vmatprep.subr.bf16.mxu0 %v5424_v6 }
 0x133   :  { %5181 = vmatpush1.msk.msra.mxu1 %vm490_vm3, %v471_v5  ;;  %v5430_v14 = vpack.c.bf16 %v405_v7, %v399_v63  ;;  %5427 = vmatpush1.bf16.msra.mxu0 %v5426_v0  ;;  %v853_v7 = vld [vmem:[#allocation3 + $0xc8] sm:$0x1] }
 0x134   :  { %v384_v15 = vpop.f32.mrb[12].mxu0  ;;  %5182 = vmatmul.mubr.msk.f32.vlgmr.msra.gmra.mrb[8].mxu1 %vm477_vm4, %v443_v11  ;;  %v5428_v16 = vpack.c.bf16 %v406_v13, %v400_v3  ;;  %5186 = vmatprep.subr.msk.mxu0 %vm490_vm3, %v474_v12 }
 0x135   :  { %v386_v18 = vpop.f32.mrb[13].mxu0  ;;  %579 = vmatprep.mubr.f32.mxu1 %v5815_v2  ;;  %v411_v20 = vmax.f32 %v384_v15, 0.0 }
 0x136   :  { %5429 = vmatprep.subr.bf16.mxu1 %v5428_v16  ;;  %v412_v21 = vmax.f32 %v386_v18, 0.0  ;;  %v852_v16 = vld [vmem:[#allocation3 + $0xc0] sm:$0x1] }
 0x137   :  { %5431 = vmatpush1.bf16.msra.mxu1 %v5430_v14  ;;  %5187 = vmatpush1.msk.msra.mxu0 %vm490_vm3, %v473_v17 }
 0x138   :  { %v390_v22 = vpop.f32.mrb[14].mxu0  ;;  %5183 = vmatmul.mubr.msk.f32.gmra.mrb[10].mxu1 %vm477_vm4, %v444_v19  ;;  %5188 = vmatmul.mubr.msk.f32.vlgmr.msra.gmra.mrb[16].mxu0 %vm477_vm4, %v443_v11 }
 0x139   :  { %v417_v23 = vmax.f32 %v390_v22, 0.0  ;;  %v392_v24 = vpop.f32.mrb[15].mxu0  ;;  %585 = vmatprep.mubr.f32.mxu1 %v5815_v2  ;;  %668 = vmatprep.mubr.f32.mxu0 %v5815_v2 }
 0x13a   :  { %v418_v26 = vmax.f32 %v392_v24, 0.0 }
 0x13b   :  { %v5434_v27 = vpack.c.bf16 %v417_v23, %v411_v20  ;;  %v824_v20 = vld [vmem:[#allocation8 + $0x40] sm:$0xff]  ;;  %v855_v23 = vld [vmem:[#allocation3 + $0xd8] sm:$0x1] }
 0x13c   :  { %5184 = vmatmul.mubr.msk.f32.gmra.mrb[12].mxu1 %vm477_vm4, %v445_v25  ;;  %v5432_v28 = vpack.c.bf16 %v418_v26, %v412_v21  ;;  %5189 = vmatmul.mubr.msk.f32.gmra.mrb[18].mxu0 %vm477_vm4, %v444_v19 }
 0x13d   :  { %591 = vmatprep.mubr.f32.mxu1 %v5815_v2  ;;  %674 = vmatprep.mubr.f32.mxu0 %v5815_v2 }
 0x13e   :  { %5433 = vmatprep.subr.bf16.mxu1 %v5432_v28  ;;  %v825_v28 = vld [vmem:[#allocation8 + $0x48] sm:$0xff] }
 0x13f   :  { %5435 = vmatpush1.bf16.msra.mxu1 %v5434_v27 }
 0x140   :  { %5185 = vmatmul.mubr.msk.f32.gmra.mrb[14].mxu1 %vm477_vm4, %v446_v29  ;;  %5192 = vmatprep.subr.msk.mxu1 %vm490_vm3, %v476_v30 }
 0x141   :  { %751 = vmatprep.mubr.f32.mxu1 %v5815_v2  ;;  %5190 = vmatmul.mubr.msk.f32.gmra.mrb[20].mxu0 %vm477_vm4, %v445_v25 }
 0x142   :  { %680 = vmatprep.mubr.f32.mxu0 %v5815_v2 }
 0x143   :  { %5193 = vmatpush1.msk.msra.mxu1 %vm490_vm3, %v475_v31 }
 0x144   :  { %5194 = vmatmul.mubr.msk.f32.vlgmr.msra.gmra.mrb[16].mxu1 %vm477_vm4, %v443_v11 }
 0x145   :  { %757 = vmatprep.mubr.f32.mxu1 %v5815_v2  ;;  %5191 = vmatmul.mubr.msk.f32.gmra.mrb[22].mxu0 %vm477_vm4, %v446_v29 }
 0x146   :  { %952 = vmatprep.mubr.f32.mxu0 %v5815_v2 }
 0x148   :  { %5195 = vmatmul.mubr.msk.f32.gmra.mrb[18].mxu1 %vm477_vm4, %v444_v19 }
 0x149   :  { %763 = vmatprep.mubr.f32.mxu1 %v5815_v2 }
 0x14c   :  { %5196 = vmatmul.mubr.msk.f32.gmra.mrb[20].mxu1 %vm477_vm4, %v445_v25 }
 0x14d   :  { %769 = vmatprep.mubr.f32.mxu1 %v5815_v2 }
 0x150   :  { %5197 = vmatmul.mubr.msk.f32.gmra.mrb[22].mxu1 %vm477_vm4, %v446_v29  ;;  %v854_v29 = vld [vmem:[#allocation3 + $0xd0] sm:$0x1] }
 0x151   :  { %1041 = vmatprep.mubr.f32.mxu1 %v5815_v2 }
 0x207   :  { %v575_v32 = vpop.f32.mrb[8].mxu1 }
 0x208   :  { %v577_v33 = vpop.f32.mrb[9].mxu1  ;;  %v776_v36 = vmax.f32 %v575_v32, 0.0 }
 0x209   :  { %v777_v40 = vmax.f32 %v577_v33, 0.0 }
 0x20b   :  { %v581_v34 = vpop.f32.mrb[10].mxu1  ;;  %v664_v35 = vpop.f32.mrb[16].mxu0 }
 0x20c   :  { %v782_v37 = vmax.f32 %v581_v34, 0.0  ;;  %v583_v38 = vpop.f32.mrb[11].mxu1  ;;  %v666_v39 = vpop.f32.mrb[17].mxu0  ;;  %v778_v43 = vmax.f32 %v664_v35, 0.0  ;;  %v826_v35 = vld [vmem:[#allocation8 + $0x50] sm:$0xff] }
 0x20d   :  { %v783_v41 = vmax.f32 %v583_v38, 0.0  ;;  %v779_v46 = vmax.f32 %v666_v39, 0.0  ;;  %v827_v39 = vld [vmem:[#allocation8 + $0x58] sm:$0xff] }
 0x20e   :  { %v5438_v42 = vpack.c.bf16 %v782_v37, %v776_v36 }
 0x20f   :  { %v587_v44 = vpop.f32.mrb[12].mxu1  ;;  %v5436_v45 = vpack.c.bf16 %v783_v41, %v777_v40  ;;  %v670_v47 = vpop.f32.mrb[18].mxu0  ;;  %v857_v40 = vld [vmem:[#allocation3 + $0xe8] sm:$0x1]  ;;  %v856_v41 = vld [vmem:[#allocation3 + $0xe0] sm:$0x1] }
 0x210   :  { %v589_v48 = vpop.f32.mrb[13].mxu1  ;;  %v784_v49 = vmax.f32 %v670_v47, 0.0  ;;  %v672_v50 = vpop.f32.mrb[19].mxu0  ;;  %v788_v55 = vmax.f32 %v587_v44, 0.0 }
 0x211   :  { %5437 = vmatprep.subr.bf16.mxu0 %v5436_v45  ;;  %v785_v51 = vmax.f32 %v672_v50, 0.0  ;;  %v789_v59 = vmax.f32 %v589_v48, 0.0 }
 0x212   :  { %5439 = vmatpush1.bf16.msra.mxu0 %v5438_v42  ;;  %v5446_v52 = vpack.c.bf16 %v784_v49, %v778_v43 }
 0x213   :  { %v593_v53 = vpop.f32.mrb[14].mxu1  ;;  %v5444_v54 = vpack.c.bf16 %v785_v51, %v779_v46 }
 0x214   :  { %v794_v56 = vmax.f32 %v593_v53, 0.0  ;;  %v595_v57 = vpop.f32.mrb[15].mxu1  ;;  %v676_v58 = vpop.f32.mrb[20].mxu0 }
 0x215   :  { %v795_v60 = vmax.f32 %v595_v57, 0.0  ;;  %v678_v61 = vpop.f32.mrb[21].mxu0  ;;  %5445 = vmatprep.subr.bf16.mxu1 %v5444_v54  ;;  %v790_v3 = vmax.f32 %v676_v58, 0.0 }
 0x216   :  { %v5442_v62 = vpack.c.bf16 %v794_v56, %v788_v55  ;;  %5447 = vmatpush1.bf16.msra.mxu1 %v5446_v52  ;;  %v791_v5 = vmax.f32 %v678_v61, 0.0 }
 0x217   :  { %v753_v63 = vpop.f32.mrb[16].mxu1  ;;  %v5440_v0 = vpack.c.bf16 %v795_v60, %v789_v59 }
 0x218   :  { %v755_v4 = vpop.f32.mrb[17].mxu1  ;;  %v682_v6 = vpop.f32.mrb[22].mxu0  ;;  %v780_v12 = vmax.f32 %v753_v63, 0.0 }
 0x219   :  { %5441 = vmatprep.subr.bf16.mxu0 %v5440_v0  ;;  %v796_v10 = vmax.f32 %v682_v6, 0.0  ;;  %v684_v11 = vpop.f32.mrb[23].mxu0  ;;  %v781_v14 = vmax.f32 %v755_v4, 0.0 }
 0x21a   :  { %5443 = vmatpush1.bf16.msra.mxu0 %v5442_v62  ;;  %v797_v13 = vmax.f32 %v684_v11, 0.0 }
 0x21b   :  { %v759_v15 = vpop.f32.mrb[18].mxu1  ;;  %5198 = vmatprep.subr.msk.mxu0 %vm490_vm3, %v853_v7  ;;  %v5450_v17 = vpack.c.bf16 %v796_v10, %v790_v3 }
 0x21c   :  { %v786_v18 = vmax.f32 %v759_v15, 0.0  ;;  %v761_v19 = vpop.f32.mrb[19].mxu1  ;;  %v5448_v21 = vpack.c.bf16 %v797_v13, %v791_v5 }
 0x21d   :  { %v787_v22 = vmax.f32 %v761_v19, 0.0  ;;  %v1232_v19 = vld [vmem:[#allocation3 + $0xc8] sm:$0x1] }
 0x21e   :  { %5199 = vmatpush1.msk.msra.mxu0 %vm490_vm3, %v852_v16  ;;  %v5454_v24 = vpack.c.bf16 %v786_v18, %v780_v12  ;;  %5449 = vmatprep.subr.bf16.mxu1 %v5448_v21 }
 0x21f   :  { %v765_v25 = vpop.f32.mrb[20].mxu1  ;;  %5200 = vmatmul.mubr.msk.f32.vlgmr.msra.gmra.mrb[24].mxu0 %vm477_vm4, %v824_v20  ;;  %v5452_v26 = vpack.c.bf16 %v787_v22, %v781_v14  ;;  %5451 = vmatpush1.bf16.msra.mxu1 %v5450_v17 }
 0x220   :  { %v767_v27 = vpop.f32.mrb[21].mxu1  ;;  %958 = vmatprep.mubr.f32.mxu0 %v5815_v2  ;;  %5204 = vmatprep.subr.msk.mxu1 %vm490_vm3, %v855_v23  ;;  %v792_v30 = vmax.f32 %v765_v25, 0.0 }
 0x221   :  { %5453 = vmatprep.subr.bf16.mxu0 %v5452_v26  ;;  %v793_v31 = vmax.f32 %v767_v27, 0.0  ;;  %v1231_v26 = vld [vmem:[#allocation3 + $0xc0] sm:$0x1] }
 0x222   :  { %5455 = vmatpush1.bf16.msra.mxu0 %v5454_v24 }
 0x223   :  { %v771_v32 = vpop.f32.mrb[22].mxu1  ;;  %5201 = vmatmul.mubr.msk.f32.gmra.mrb[26].mxu0 %vm477_vm4, %v825_v28  ;;  %5205 = vmatpush1.msk.msra.mxu1 %vm490_vm3, %v854_v29 }
 0x224   :  { %v798_v33 = vmax.f32 %v771_v32, 0.0  ;;  %v773_v34 = vpop.f32.mrb[23].mxu1  ;;  %964 = vmatprep.mubr.f32.mxu0 %v5815_v2  ;;  %5206 = vmatmul.mubr.msk.f32.vlgmr.msra.gmra.mrb[24].mxu1 %vm477_vm4, %v824_v20 }
 0x225   :  { %v799_v36 = vmax.f32 %v773_v34, 0.0  ;;  %1047 = vmatprep.mubr.f32.mxu1 %v5815_v2 }
 0x226   :  { %v5458_v37 = vpack.c.bf16 %v798_v33, %v792_v30  ;;  %v1203_v30 = vld [vmem:[#allocation8 + $0x60] sm:$0xff]  ;;  %v1234_v33 = vld [vmem:[#allocation3 + $0xd8] sm:$0x1] }
 0x227   :  { %5202 = vmatmul.mubr.msk.f32.gmra.mrb[28].mxu0 %vm477_vm4, %v826_v35  ;;  %v5456_v38 = vpack.c.bf16 %v799_v36, %v793_v31 }
 0x228   :  { %970 = vmatprep.mubr.f32.mxu0 %v5815_v2  ;;  %5207 = vmatmul.mubr.msk.f32.gmra.mrb[26].mxu1 %vm477_vm4, %v825_v28 }
 0x229   :  { %5457 = vmatprep.subr.bf16.mxu0 %v5456_v38  ;;  %1053 = vmatprep.mubr.f32.mxu1 %v5815_v2  ;;  %v1204_v38 = vld [vmem:[#allocation8 + $0x68] sm:$0xff] }
 0x22a   :  { %5459 = vmatpush1.bf16.msra.mxu0 %v5458_v37 }
 0x22b   :  { %5203 = vmatmul.mubr.msk.f32.gmra.mrb[30].mxu0 %vm477_vm4, %v827_v39  ;;  %5210 = vmatprep.subr.msk.mxu0 %vm490_vm3, %v857_v40 }
 0x22c   :  { %1130 = vmatprep.mubr.f32.mxu0 %v5815_v2  ;;  %5208 = vmatmul.mubr.msk.f32.gmra.mrb[28].mxu1 %vm477_vm4, %v826_v35 }
 0x22d   :  { %1059 = vmatprep.mubr.f32.mxu1 %v5815_v2 }
 0x22e   :  { %5211 = vmatpush1.msk.msra.mxu0 %vm490_vm3, %v856_v41 }
 0x22f   :  { %5212 = vmatmul.mubr.msk.f32.vlgmr.msra.gmra.mrb[32].mxu0 %vm477_vm4, %v824_v20 }
 0x230   :  { %1136 = vmatprep.mubr.f32.mxu0 %v5815_v2  ;;  %5209 = vmatmul.mubr.msk.f32.gmra.mrb[30].mxu1 %vm477_vm4, %v827_v39 }
 0x231   :  { %1331 = vmatprep.mubr.f32.mxu1 %v5815_v2 }
 0x233   :  { %5213 = vmatmul.mubr.msk.f32.gmra.mrb[34].mxu0 %vm477_vm4, %v825_v28 }
 0x234   :  { %1142 = vmatprep.mubr.f32.mxu0 %v5815_v2 }
 0x237   :  { %5214 = vmatmul.mubr.msk.f32.gmra.mrb[36].mxu0 %vm477_vm4, %v826_v35 }
 0x238   :  { %1148 = vmatprep.mubr.f32.mxu0 %v5815_v2 }
 0x23b   :  { %5215 = vmatmul.mubr.msk.f32.gmra.mrb[38].mxu0 %vm477_vm4, %v827_v39  ;;  %v1233_v39 = vld [vmem:[#allocation3 + $0xd0] sm:$0x1] }
 0x23c   :  { %1420 = vmatprep.mubr.f32.mxu0 %v5815_v2 }
 0x2f2   :  { %v954_v42 = vpop.f32.mrb[24].mxu0 }
 0x2f3   :  { %v956_v43 = vpop.f32.mrb[25].mxu0  ;;  %v1155_v45 = vmax.f32 %v954_v42, 0.0 }
 0x2f4   :  { %v1156_v49 = vmax.f32 %v956_v43, 0.0 }
 0x2f6   :  { %v960_v44 = vpop.f32.mrb[26].mxu0 }
 0x2f7   :  { %v1161_v46 = vmax.f32 %v960_v44, 0.0  ;;  %v962_v47 = vpop.f32.mrb[27].mxu0  ;;  %v1043_v48 = vpop.f32.mrb[24].mxu1 }
 0x2f8   :  { %v1162_v50 = vmax.f32 %v962_v47, 0.0  ;;  %v1045_v51 = vpop.f32.mrb[25].mxu1  ;;  %v1157_v55 = vmax.f32 %v1043_v48, 0.0 }
 0x2f9   :  { %v5462_v52 = vpack.c.bf16 %v1161_v46, %v1155_v45  ;;  %v1158_v57 = vmax.f32 %v1045_v51, 0.0  ;;  %v1205_v45 = vld [vmem:[#allocation8 + $0x70] sm:$0xff]  ;;  %v1235_v51 = vld [vmem:[#allocation3 + $0xe0] sm:$0x1] }
 0x2fa   :  { %v966_v53 = vpop.f32.mrb[28].mxu0  ;;  %v5460_v54 = vpack.c.bf16 %v1162_v50, %v1156_v49  ;;  %v1206_v49 = vld [vmem:[#allocation8 + $0x78] sm:$0xff]  ;;  %v1236_v50 = vld [vmem:[#allocation3 + $0xe8] sm:$0x1] }
 0x2fb   :  { %v968_v56 = vpop.f32.mrb[29].mxu0  ;;  %v1049_v58 = vpop.f32.mrb[26].mxu1  ;;  %v1167_v0 = vmax.f32 %v966_v53, 0.0 }
 0x2fc   :  { %5461 = vmatprep.subr.bf16.mxu1 %v5460_v54  ;;  %v1163_v59 = vmax.f32 %v1049_v58, 0.0  ;;  %v1051_v60 = vpop.f32.mrb[27].mxu1  ;;  %v1168_v7 = vmax.f32 %v968_v56, 0.0 }
 0x2fd   :  { %5463 = vmatpush1.bf16.msra.mxu1 %v5462_v52  ;;  %v1164_v61 = vmax.f32 %v1051_v60, 0.0 }
 0x2fe   :  { %v972_v62 = vpop.f32.mrb[30].mxu0  ;;  %v5470_v63 = vpack.c.bf16 %v1163_v59, %v1157_v55 }
 0x2ff   :  { %v1173_v3 = vmax.f32 %v972_v62, 0.0  ;;  %v974_v4 = vpop.f32.mrb[31].mxu0  ;;  %v1055_v5 = vpop.f32.mrb[28].mxu1  ;;  %v5468_v6 = vpack.c.bf16 %v1164_v61, %v1158_v57 }
 0x300   :  { %v1174_v10 = vmax.f32 %v974_v4, 0.0  ;;  %v1057_v11 = vpop.f32.mrb[29].mxu1  ;;  %v1169_v15 = vmax.f32 %v1055_v5, 0.0 }
 0x301   :  { %v5466_v12 = vpack.c.bf16 %v1173_v3, %v1167_v0  ;;  %5469 = vmatprep.subr.bf16.mxu0 %v5468_v6  ;;  %v1170_v17 = vmax.f32 %v1057_v11, 0.0 }
 0x302   :  { %v1132_v13 = vpop.f32.mrb[32].mxu0  ;;  %v5464_v14 = vpack.c.bf16 %v1174_v10, %v1168_v7  ;;  %5471 = vmatpush1.bf16.msra.mxu0 %v5470_v63 }
 0x303   :  { %v1134_v16 = vpop.f32.mrb[33].mxu0  ;;  %v1061_v18 = vpop.f32.mrb[30].mxu1  ;;  %v1159_v22 = vmax.f32 %v1132_v13, 0.0 }
 0x304   :  { %5465 = vmatprep.subr.bf16.mxu1 %v5464_v14  ;;  %v1175_v20 = vmax.f32 %v1061_v18, 0.0  ;;  %v1063_v21 = vpop.f32.mrb[31].mxu1  ;;  %v1160_v24 = vmax.f32 %v1134_v16, 0.0 }
 0x305   :  { %5467 = vmatpush1.bf16.msra.mxu1 %v5466_v12  ;;  %v1176_v23 = vmax.f32 %v1063_v21, 0.0 }
 0x306   :  { %v1138_v25 = vpop.f32.mrb[34].mxu0  ;;  %5216 = vmatprep.subr.msk.mxu1 %vm490_vm3, %v1232_v19  ;;  %v5474_v27 = vpack.c.bf16 %v1175_v20, %v1169_v15 }
 0x307   :  { %v1165_v28 = vmax.f32 %v1138_v25, 0.0  ;;  %v1140_v29 = vpop.f32.mrb[35].mxu0  ;;  %v5472_v31 = vpack.c.bf16 %v1176_v23, %v1170_v17 }
 0x308   :  { %v1166_v32 = vmax.f32 %v1140_v29, 0.0  ;;  %v1615_v29 = vld [vmem:[#allocation3 + $0xc8] sm:$0x1] }
 0x309   :  { %5217 = vmatpush1.msk.msra.mxu1 %vm490_vm3, %v1231_v26  ;;  %v5478_v34 = vpack.c.bf16 %v1165_v28, %v1159_v22  ;;  %5473 = vmatprep.subr.bf16.mxu0 %v5472_v31 }
 0x30a   :  { %v1144_v35 = vpop.f32.mrb[36].mxu0  ;;  %5218 = vmatmul.mubr.msk.f32.vlgmr.msra.gmra.mrb[32].mxu1 %vm477_vm4, %v1203_v30  ;;  %v5476_v36 = vpack.c.bf16 %v1166_v32, %v1160_v24  ;;  %5475 = vmatpush1.bf16.msra.mxu0 %v5474_v27 }
 0x30b   :  { %v1146_v37 = vpop.f32.mrb[37].mxu0  ;;  %1337 = vmatprep.mubr.f32.mxu1 %v5815_v2  ;;  %5222 = vmatprep.subr.msk.mxu0 %vm490_vm3, %v1234_v33  ;;  %v1171_v40 = vmax.f32 %v1144_v35, 0.0 }
 0x30c   :  { %5477 = vmatprep.subr.bf16.mxu1 %v5476_v36  ;;  %v1172_v41 = vmax.f32 %v1146_v37, 0.0  ;;  %v1614_v36 = vld [vmem:[#allocation3 + $0xc0] sm:$0x1] }
 0x30d   :  { %5479 = vmatpush1.bf16.msra.mxu1 %v5478_v34 }
 0x30e   :  { %v1150_v42 = vpop.f32.mrb[38].mxu0  ;;  %5219 = vmatmul.mubr.msk.f32.gmra.mrb[34].mxu1 %vm477_vm4, %v1204_v38  ;;  %5223 = vmatpush1.msk.msra.mxu0 %vm490_vm3, %v1233_v39 }
 0x30f   :  { %v1177_v43 = vmax.f32 %v1150_v42, 0.0  ;;  %v1152_v44 = vpop.f32.mrb[39].mxu0  ;;  %1343 = vmatprep.mubr.f32.mxu1 %v5815_v2  ;;  %5224 = vmatmul.mubr.msk.f32.vlgmr.msra.gmra.mrb[40].mxu0 %vm477_vm4, %v1203_v30 }
 0x310   :  { %v1178_v46 = vmax.f32 %v1152_v44, 0.0  ;;  %1426 = vmatprep.mubr.f32.mxu0 %v5815_v2 }
 0x311   :  { %v5482_v47 = vpack.c.bf16 %v1177_v43, %v1171_v40  ;;  %v6028_v40 = vld [vmem:[#allocation8 + $0x80] sm:$0xff]  ;;  %v1617_v43 = vld [vmem:[#allocation3 + $0xd8] sm:$0x1] }
 0x312   :  { %5220 = vmatmul.mubr.msk.f32.gmra.mrb[36].mxu1 %vm477_vm4, %v1205_v45  ;;  %v5480_v48 = vpack.c.bf16 %v1178_v46, %v1172_v41 }
 0x313   :  { %1349 = vmatprep.mubr.f32.mxu1 %v5815_v2  ;;  %5225 = vmatmul.mubr.msk.f32.gmra.mrb[42].mxu0 %vm477_vm4, %v1204_v38 }
 0x314   :  { %5481 = vmatprep.subr.bf16.mxu1 %v5480_v48  ;;  %1432 = vmatprep.mubr.f32.mxu0 %v5815_v2  ;;  %v1583_v48 = vld [vmem:[#allocation8 + $0x88] sm:$0xff] }
 0x315   :  { %5483 = vmatpush1.bf16.msra.mxu1 %v5482_v47 }
 0x316   :  { %5221 = vmatmul.mubr.msk.f32.gmra.mrb[38].mxu1 %vm477_vm4, %v1206_v49  ;;  %5228 = vmatprep.subr.msk.mxu1 %vm490_vm3, %v1236_v50 }
 0x317   :  { %1509 = vmatprep.mubr.f32.mxu1 %v5815_v2  ;;  %5226 = vmatmul.mubr.msk.f32.gmra.mrb[44].mxu0 %vm477_vm4, %v1205_v45 }
 0x318   :  { %1438 = vmatprep.mubr.f32.mxu0 %v5815_v2 }
 0x319   :  { %5229 = vmatpush1.msk.msra.mxu1 %vm490_vm3, %v1235_v51 }
 0x31a   :  { %5230 = vmatmul.mubr.msk.f32.vlgmr.msra.gmra.mrb[40].mxu1 %vm477_vm4, %v1203_v30 }
 0x31b   :  { %1515 = vmatprep.mubr.f32.mxu1 %v5815_v2  ;;  %5227 = vmatmul.mubr.msk.f32.gmra.mrb[46].mxu0 %vm477_vm4, %v1206_v49 }
 0x31c   :  { %1726 = vmatprep.mubr.f32.mxu0 %v5815_v2 }
 0x31e   :  { %5231 = vmatmul.mubr.msk.f32.gmra.mrb[42].mxu1 %vm477_vm4, %v1204_v38 }
 0x31f   :  { %1521 = vmatprep.mubr.f32.mxu1 %v5815_v2 }
 0x322   :  { %5232 = vmatmul.mubr.msk.f32.gmra.mrb[44].mxu1 %vm477_vm4, %v1205_v45 }
 0x323   :  { %1527 = vmatprep.mubr.f32.mxu1 %v5815_v2 }
 0x326   :  { %5233 = vmatmul.mubr.msk.f32.gmra.mrb[46].mxu1 %vm477_vm4, %v1206_v49  ;;  %v1616_v49 = vld [vmem:[#allocation3 + $0xd0] sm:$0x1] }
 0x327   :  { %1839 = vmatprep.mubr.f32.mxu1 %v5815_v2 }
 0x3dd   :  { %v1333_v52 = vpop.f32.mrb[32].mxu1 }
 0x3de   :  { %v1335_v53 = vpop.f32.mrb[33].mxu1  ;;  %v1534_v55 = vmax.f32 %v1333_v52, 0.0 }
 0x3df   :  { %v1535_v59 = vmax.f32 %v1335_v53, 0.0 }
 0x3e1   :  { %v1339_v54 = vpop.f32.mrb[34].mxu1 }
 0x3e2   :  { %v1540_v56 = vmax.f32 %v1339_v54, 0.0  ;;  %v1341_v57 = vpop.f32.mrb[35].mxu1  ;;  %v1422_v58 = vpop.f32.mrb[40].mxu0 }
 0x3e3   :  { %v1541_v60 = vmax.f32 %v1341_v57, 0.0  ;;  %v1424_v61 = vpop.f32.mrb[41].mxu0  ;;  %v1536_v3 = vmax.f32 %v1422_v58, 0.0 }
 0x3e4   :  { %v5486_v62 = vpack.c.bf16 %v1540_v56, %v1534_v55  ;;  %v1537_v5 = vmax.f32 %v1424_v61, 0.0  ;;  %v1584_v55 = vld [vmem:[#allocation8 + $0x90] sm:$0xff]  ;;  %v1618_v61 = vld [vmem:[#allocation3 + $0xe0] sm:$0x1] }
 0x3e5   :  { %v1345_v63 = vpop.f32.mrb[36].mxu1  ;;  %v5484_v0 = vpack.c.bf16 %v1541_v60, %v1535_v59  ;;  %v1585_v59 = vld [vmem:[#allocation8 + $0x98] sm:$0xff]  ;;  %v1619_v60 = vld [vmem:[#allocation3 + $0xe8] sm:$0x1] }
 0x3e6   :  { %v1347_v4 = vpop.f32.mrb[37].mxu1  ;;  %v1428_v6 = vpop.f32.mrb[42].mxu0  ;;  %v1546_v14 = vmax.f32 %v1345_v63, 0.0  ;;  %v1587_v63 = vld [vmem:[#allocation8 + $0xa8] sm:$0xff] }
 0x3e7   :  { %5485 = vmatprep.subr.bf16.mxu0 %v5484_v0  ;;  %v1542_v7 = vmax.f32 %v1428_v6, 0.0  ;;  %v1430_v10 = vpop.f32.mrb[43].mxu0  ;;  %v1547_v19 = vmax.f32 %v1347_v4, 0.0  ;;  %v1588_v0 = vld [vmem:[#allocation8 + $0xb0] sm:$0xff] }
 0x3e8   :  { %5487 = vmatpush1.bf16.msra.mxu0 %v5486_v62  ;;  %v1543_v11 = vmax.f32 %v1430_v10, 0.0  ;;  %v1586_v62 = vld [vmem:[#allocation8 + $0xa0] sm:$0xff] }
 0x3e9   :  { %v1351_v12 = vpop.f32.mrb[38].mxu1  ;;  %v5494_v13 = vpack.c.bf16 %v1542_v7, %v1536_v3  ;;  %v1589_v3 = vld [vmem:[#allocation8 + $0xb8] sm:$0xff] }
 0x3ea   :  { %v1552_v15 = vmax.f32 %v1351_v12, 0.0  ;;  %v1353_v16 = vpop.f32.mrb[39].mxu1  ;;  %v1434_v17 = vpop.f32.mrb[44].mxu0  ;;  %v5492_v18 = vpack.c.bf16 %v1543_v11, %v1537_v5 }
 0x3eb   :  { %v1553_v20 = vmax.f32 %v1353_v16, 0.0  ;;  %v1436_v21 = vpop.f32.mrb[45].mxu0  ;;  %v1548_v25 = vmax.f32 %v1434_v17, 0.0 }
 0x3ec   :  { %v5490_v22 = vpack.c.bf16 %v1552_v15, %v1546_v14  ;;  %5493 = vmatprep.subr.bf16.mxu1 %v5492_v18  ;;  %v1549_v27 = vmax.f32 %v1436_v21, 0.0 }
 0x3ed   :  { %v1511_v23 = vpop.f32.mrb[40].mxu1  ;;  %v5488_v24 = vpack.c.bf16 %v1553_v20, %v1547_v19  ;;  %5495 = vmatpush1.bf16.msra.mxu1 %v5494_v13 }
 0x3ee   :  { %v1513_v26 = vpop.f32.mrb[41].mxu1  ;;  %v1440_v28 = vpop.f32.mrb[46].mxu0  ;;  %v1538_v32 = vmax.f32 %v1511_v23, 0.0 }
 0x3ef   :  { %5489 = vmatprep.subr.bf16.mxu0 %v5488_v24  ;;  %v1554_v30 = vmax.f32 %v1440_v28, 0.0  ;;  %v1442_v31 = vpop.f32.mrb[47].mxu0  ;;  %v1539_v34 = vmax.f32 %v1513_v26, 0.0 }
 0x3f0   :  { %5491 = vmatpush1.bf16.msra.mxu0 %v5490_v22  ;;  %v1555_v33 = vmax.f32 %v1442_v31, 0.0 }
 0x3f1   :  { %v1517_v35 = vpop.f32.mrb[42].mxu1  ;;  %5234 = vmatprep.subr.msk.mxu0 %vm490_vm3, %v1615_v29  ;;  %v5498_v37 = vpack.c.bf16 %v1554_v30, %v1548_v25 }
 0x3f2   :  { %v1544_v38 = vmax.f32 %v1517_v35, 0.0  ;;  %v1519_v39 = vpop.f32.mrb[43].mxu1  ;;  %v5496_v41 = vpack.c.bf16 %v1555_v33, %v1549_v27 }
 0x3f3   :  { %v1545_v42 = vmax.f32 %v1519_v39, 0.0 }
 0x3f4   :  { %5235 = vmatpush1.msk.msra.mxu0 %vm490_vm3, %v1614_v36  ;;  %v5502_v44 = vpack.c.bf16 %v1544_v38, %v1538_v32  ;;  %5497 = vmatprep.subr.bf16.mxu1 %v5496_v41 }
 0x3f5   :  { %v1523_v45 = vpop.f32.mrb[44].mxu1  ;;  %5236 = vmatmul.mubr.msk.f32.vlgmr.msra.gmra.mrb[48].mxu0 %vm477_vm4, %v6028_v40  ;;  %v5500_v46 = vpack.c.bf16 %v1545_v42, %v1539_v34  ;;  %5499 = vmatpush1.bf16.msra.mxu1 %v5498_v37 }
 0x3f6   :  { %v1525_v47 = vpop.f32.mrb[45].mxu1  ;;  %1732 = vmatprep.mubr.f32.mxu0 %v5815_v2  ;;  %5244 = vmatprep.subr.msk.mxu1 %vm490_vm3, %v1617_v43  ;;  %v1550_v50 = vmax.f32 %v1523_v45, 0.0 }
 0x3f7   :  { %5501 = vmatprep.subr.bf16.mxu0 %v5500_v46  ;;  %v1551_v51 = vmax.f32 %v1525_v47, 0.0 }
 0x3f8   :  { %5503 = vmatpush1.bf16.msra.mxu0 %v5502_v44 }
 0x3f9   :  { %v1529_v52 = vpop.f32.mrb[46].mxu1  ;;  %5237 = vmatmul.mubr.msk.f32.gmra.mrb[50].mxu0 %vm477_vm4, %v1583_v48  ;;  %5245 = vmatpush1.msk.msra.mxu1 %vm490_vm3, %v1616_v49 }
 0x3fa   :  { %v1556_v53 = vmax.f32 %v1529_v52, 0.0  ;;  %v1531_v54 = vpop.f32.mrb[47].mxu1  ;;  %1738 = vmatprep.mubr.f32.mxu0 %v5815_v2  ;;  %5246 = vmatmul.mubr.msk.f32.vlgmr.msra.gmra.mrb[48].mxu1 %vm477_vm4, %v6028_v40 }
 0x3fb   :  { %v1557_v56 = vmax.f32 %v1531_v54, 0.0  ;;  %1845 = vmatprep.mubr.f32.mxu1 %v5815_v2 }
 0x3fc   :  { %v5506_v57 = vpack.c.bf16 %v1556_v53, %v1550_v50 }
 0x3fd   :  { %5238 = vmatmul.mubr.msk.f32.gmra.mrb[52].mxu0 %vm477_vm4, %v1584_v55  ;;  %v5504_v58 = vpack.c.bf16 %v1557_v56, %v1551_v51 }
 0x3fe   :  { %1744 = vmatprep.mubr.f32.mxu0 %v5815_v2  ;;  %5247 = vmatmul.mubr.msk.f32.gmra.mrb[50].mxu1 %vm477_vm4, %v1583_v48 }
 0x3ff   :  { %5505 = vmatprep.subr.bf16.mxu0 %v5504_v58  ;;  %1851 = vmatprep.mubr.f32.mxu1 %v5815_v2 }
 0x400   :  { %5507 = vmatpush1.bf16.msra.mxu0 %v5506_v57 }
 0x401   :  { %5239 = vmatmul.mubr.msk.f32.gmra.mrb[54].mxu0 %vm477_vm4, %v1585_v59  ;;  %5254 = vmatprep.subr.msk.mxu0 %vm490_vm3, %v1619_v60 }
 0x402   :  { %1750 = vmatprep.mubr.f32.mxu0 %v5815_v2  ;;  %5248 = vmatmul.mubr.msk.f32.gmra.mrb[52].mxu1 %vm477_vm4, %v1584_v55 }
 0x403   :  { %1857 = vmatprep.mubr.f32.mxu1 %v5815_v2 }
 0x404   :  { %5255 = vmatpush1.msk.msra.mxu0 %vm490_vm3, %v1618_v61 }
 0x405   :  { %5240 = vmatmul.mubr.msk.f32.gmra.mrb[56].mxu0 %vm477_vm4, %v1586_v62 }
 0x406   :  { %1756 = vmatprep.mubr.f32.mxu0 %v5815_v2  ;;  %5249 = vmatmul.mubr.msk.f32.gmra.mrb[54].mxu1 %vm477_vm4, %v1585_v59 }
 0x407   :  { %1863 = vmatprep.mubr.f32.mxu1 %v5815_v2 }
 0x409   :  { %5241 = vmatmul.mubr.msk.f32.gmra.mrb[58].mxu0 %vm477_vm4, %v1587_v63 }
 0x40a   :  { %1762 = vmatprep.mubr.f32.mxu0 %v5815_v2  ;;  %5250 = vmatmul.mubr.msk.f32.gmra.mrb[56].mxu1 %vm477_vm4, %v1586_v62 }
 0x40b   :  { %1869 = vmatprep.mubr.f32.mxu1 %v5815_v2 }
 0x40d   :  { %5242 = vmatmul.mubr.msk.f32.gmra.mrb[60].mxu0 %vm477_vm4, %v1588_v0 }
 0x40e   :  { %1768 = vmatprep.mubr.f32.mxu0 %v5815_v2  ;;  %5251 = vmatmul.mubr.msk.f32.gmra.mrb[58].mxu1 %vm477_vm4, %v1587_v63 }
 0x40f   :  { %1875 = vmatprep.mubr.f32.mxu1 %v5815_v2 }
 0x411   :  { %5243 = vmatmul.mubr.msk.f32.gmra.mrb[62].mxu0 %vm477_vm4, %v1589_v3 }
 0x412   :  { %1952 = vmatprep.mubr.f32.mxu0 %v5815_v2  ;;  %5252 = vmatmul.mubr.msk.f32.gmra.mrb[60].mxu1 %vm477_vm4, %v1588_v0 }
 0x413   :  { %1881 = vmatprep.mubr.f32.mxu1 %v5815_v2 }
 0x415   :  { %5256 = vmatmul.mubr.msk.f32.vlgmr.msra.gmra.mrb[64].mxu0 %vm477_vm4, %v6028_v40 }
 0x416   :  { %1958 = vmatprep.mubr.f32.mxu0 %v5815_v2  ;;  %5253 = vmatmul.mubr.msk.f32.gmra.mrb[62].mxu1 %vm477_vm4, %v1589_v3 }
 0x417   :  { %2238 = vmatprep.mubr.f32.mxu1 %v5815_v2 }
 0x419   :  { %5257 = vmatmul.mubr.msk.f32.gmra.mrb[66].mxu0 %vm477_vm4, %v1583_v48 }
 0x41a   :  { %1964 = vmatprep.mubr.f32.mxu0 %v5815_v2 }
 0x41d   :  { %5258 = vmatmul.mubr.msk.f32.gmra.mrb[68].mxu0 %vm477_vm4, %v1584_v55 }
 0x41e   :  { %1970 = vmatprep.mubr.f32.mxu0 %v5815_v2 }
 0x421   :  { %5259 = vmatmul.mubr.msk.f32.gmra.mrb[70].mxu0 %vm477_vm4, %v1585_v59 }
 0x422   :  { %1976 = vmatprep.mubr.f32.mxu0 %v5815_v2 }
 0x425   :  { %5260 = vmatmul.mubr.msk.f32.gmra.mrb[72].mxu0 %vm477_vm4, %v1586_v62 }
 0x426   :  { %1982 = vmatprep.mubr.f32.mxu0 %v5815_v2 }
 0x429   :  { %5261 = vmatmul.mubr.msk.f32.gmra.mrb[74].mxu0 %vm477_vm4, %v1587_v63 }
 0x42a   :  { %1988 = vmatprep.mubr.f32.mxu0 %v5815_v2 }
 0x42d   :  { %5262 = vmatmul.mubr.msk.f32.gmra.mrb[76].mxu0 %vm477_vm4, %v1588_v0 }
 0x42e   :  { %1994 = vmatprep.mubr.f32.mxu0 %v5815_v2 }
 0x431   :  { %5263 = vmatmul.mubr.msk.f32.gmra.mrb[78].mxu0 %vm477_vm4, %v1589_v3 }
 0x432   :  { %2380 = vmatprep.mubr.f32.mxu0 %v5815_v2 }
 0x4c8   :  { %v1728_v4 = vpop.f32.mrb[48].mxu0 }
 0x4c9   :  { %v1730_v5 = vpop.f32.mrb[49].mxu0  ;;  %v2001_v7 = vmax.f32 %v1728_v4, 0.0 }
 0x4ca   :  { %v2002_v13 = vmax.f32 %v1730_v5, 0.0 }
 0x4cc   :  { %v1734_v6 = vpop.f32.mrb[50].mxu0 }
 0x4cd   :  { %v2007_v10 = vmax.f32 %v1734_v6, 0.0  ;;  %v1736_v11 = vpop.f32.mrb[51].mxu0  ;;  %v1841_v12 = vpop.f32.mrb[48].mxu1 }
 0x4ce   :  { %v2008_v14 = vmax.f32 %v1736_v11, 0.0  ;;  %v1843_v15 = vpop.f32.mrb[49].mxu1  ;;  %v2003_v19 = vmax.f32 %v1841_v12, 0.0 }
 0x4cf   :  { %v5510_v16 = vpack.c.bf16 %v2007_v10, %v2001_v7  ;;  %v2004_v21 = vmax.f32 %v1843_v15, 0.0 }
 0x4d0   :  { %v1740_v17 = vpop.f32.mrb[52].mxu0  ;;  %v5508_v18 = vpack.c.bf16 %v2008_v14, %v2002_v13 }
 0x4d1   :  { %v1742_v20 = vpop.f32.mrb[53].mxu0  ;;  %v1847_v22 = vpop.f32.mrb[50].mxu1  ;;  %v2013_v28 = vmax.f32 %v1740_v17, 0.0 }
 0x4d2   :  { %5509 = vmatprep.subr.bf16.mxu1 %v5508_v18  ;;  %v2009_v23 = vmax.f32 %v1847_v22, 0.0  ;;  %v1849_v24 = vpop.f32.mrb[51].mxu1  ;;  %v2014_v33 = vmax.f32 %v1742_v20, 0.0 }
 0x4d3   :  { %5511 = vmatpush1.bf16.msra.mxu1 %v5510_v16  ;;  %v2010_v25 = vmax.f32 %v1849_v24, 0.0 }
 0x4d4   :  { %v1746_v26 = vpop.f32.mrb[54].mxu0  ;;  %v6086_v27 = vpack.c.bf16 %v2009_v23, %v2003_v19  ;;  %v2147_v23 = vld [vmem:[#allocation4 + $0x188] sm:$0x1] }
 0x4d5   :  { %v2019_v29 = vmax.f32 %v1746_v26, 0.0  ;;  %v1748_v30 = vpop.f32.mrb[55].mxu0  ;;  %v1853_v31 = vpop.f32.mrb[52].mxu1  ;;  %v6088_v32 = vpack.c.bf16 %v2010_v25, %v2004_v21 }
 0x4d6   :  { %v2020_v34 = vmax.f32 %v1748_v30, 0.0  ;;  %v1855_v35 = vpop.f32.mrb[53].mxu1  ;;  %v2015_v39 = vmax.f32 %v1853_v31, 0.0 }
 0x4d7   :  { %v5514_v36 = vpack.c.bf16 %v2019_v29, %v2013_v28  ;;  %v2016_v41 = vmax.f32 %v1855_v35, 0.0  ;;  %v2146_v29 = vld [vmem:[#allocation4 + $0x180] sm:$0x1]  ;;  %v6093_v35 = vld [vmem:[#allocation8 + $0xc0] sm:$0x3] }
 0x4d8   :  { %v1752_v37 = vpop.f32.mrb[56].mxu0  ;;  %v5512_v38 = vpack.c.bf16 %v2020_v34, %v2014_v33 }
 0x4d9   :  { %v1754_v40 = vpop.f32.mrb[57].mxu0  ;;  %v1859_v42 = vpop.f32.mrb[54].mxu1  ;;  %v2025_v48 = vmax.f32 %v1752_v37, 0.0 }
 0x4da   :  { %5513 = vmatprep.subr.bf16.mxu1 %v5512_v38  ;;  %v2021_v43 = vmax.f32 %v1859_v42, 0.0  ;;  %v1861_v44 = vpop.f32.mrb[55].mxu1  ;;  %v2026_v53 = vmax.f32 %v1754_v40, 0.0 }
 0x4db   :  { %5515 = vmatpush1.bf16.msra.mxu1 %v5514_v36  ;;  %v2022_v45 = vmax.f32 %v1861_v44, 0.0 }
 0x4dc   :  { %v1758_v46 = vpop.f32.mrb[58].mxu0  ;;  %v6090_v47 = vpack.c.bf16 %v2021_v43, %v2015_v39 }
 0x4dd   :  { %v2031_v49 = vmax.f32 %v1758_v46, 0.0  ;;  %v1760_v50 = vpop.f32.mrb[59].mxu0  ;;  %v1865_v51 = vpop.f32.mrb[56].mxu1  ;;  %v5528_v52 = vpack.c.bf16 %v2022_v45, %v2016_v41 }
 0x4de   :  { %v2032_v54 = vmax.f32 %v1760_v50, 0.0  ;;  %v1867_v55 = vpop.f32.mrb[57].mxu1  ;;  %v2027_v59 = vmax.f32 %v1865_v51, 0.0 }
 0x4df   :  { %v5518_v56 = vpack.c.bf16 %v2031_v49, %v2025_v48  ;;  %v2028_v61 = vmax.f32 %v1867_v55, 0.0 }
 0x4e0   :  { %v1764_v57 = vpop.f32.mrb[60].mxu0  ;;  %v5516_v58 = vpack.c.bf16 %v2032_v54, %v2026_v53 }
 0x4e1   :  { %v1766_v60 = vpop.f32.mrb[61].mxu0  ;;  %v1871_v62 = vpop.f32.mrb[58].mxu1  ;;  %v2037_v6 = vmax.f32 %v1764_v57, 0.0 }
 0x4e2   :  { %5517 = vmatprep.subr.bf16.mxu1 %v5516_v58  ;;  %v2033_v63 = vmax.f32 %v1871_v62, 0.0  ;;  %v1873_v0 = vpop.f32.mrb[59].mxu1  ;;  %v2038_v13 = vmax.f32 %v1766_v60, 0.0 }
 0x4e3   :  { %5519 = vmatpush1.bf16.msra.mxu1 %v5518_v56  ;;  %v2034_v3 = vmax.f32 %v1873_v0, 0.0 }
 0x4e4   :  { %v1770_v4 = vpop.f32.mrb[62].mxu0  ;;  %v5534_v5 = vpack.c.bf16 %v2033_v63, %v2027_v59 }
 0x4e5   :  { %v2043_v7 = vmax.f32 %v1770_v4, 0.0  ;;  %v1772_v10 = vpop.f32.mrb[63].mxu0  ;;  %v1877_v11 = vpop.f32.mrb[60].mxu1  ;;  %v5532_v12 = vpack.c.bf16 %v2034_v3, %v2028_v61 }
 0x4e6   :  { %v2044_v14 = vmax.f32 %v1772_v10, 0.0  ;;  %v1879_v15 = vpop.f32.mrb[61].mxu1  ;;  %v2039_v19 = vmax.f32 %v1877_v11, 0.0  ;;  %v2151_v11 = vld [vmem:[#allocation4 + $0x1a8] sm:$0x1] }
 0x4e7   :  { %v5522_v16 = vpack.c.bf16 %v2043_v7, %v2037_v6  ;;  %v2040_v21 = vmax.f32 %v1879_v15, 0.0 }
 0x4e8   :  { %v1954_v17 = vpop.f32.mrb[64].mxu0  ;;  %v5520_v18 = vpack.c.bf16 %v2044_v14, %v2038_v13 }
 0x4e9   :  { %v1956_v20 = vpop.f32.mrb[65].mxu0  ;;  %v1883_v22 = vpop.f32.mrb[62].mxu1  ;;  %v2005_v31 = vmax.f32 %v1954_v17, 0.0 }
 0x4ea   :  { %5521 = vmatprep.subr.bf16.mxu1 %v5520_v18  ;;  %v2045_v24 = vmax.f32 %v1883_v22, 0.0  ;;  %v1885_v25 = vpop.f32.mrb[63].mxu1  ;;  %v2006_v37 = vmax.f32 %v1956_v20, 0.0 }
 0x4eb   :  { %5523 = vmatpush1.bf16.msra.mxu1 %v5522_v16  ;;  %v2046_v26 = vmax.f32 %v1885_v25, 0.0  ;;  %v5818_v16 = vmov 1966171168  }
 0x4ec   :  { %v1960_v28 = vpop.f32.mrb[66].mxu0  ;;  %5264 = vmatprep.subr.msk.mxu1 %vm490_vm3, %v2147_v23  ;;  %v5538_v30 = vpack.c.bf16 %v2045_v24, %v2039_v19  ;;  %v2398_v17 = vunpack.c.l.s4 %v5818_v16 }
 0x4ed   :  { %v2011_v33 = vmax.f32 %v1960_v28, 0.0  ;;  %v1962_v34 = vpop.f32.mrb[67].mxu0  ;;  %v5536_v36 = vpack.c.bf16 %v2046_v26, %v2040_v21 }
 0x4ee   :  { %v2012_v38 = vmax.f32 %v1962_v34, 0.0  ;;  %v2399_v18 = vunpack.c.0.s8 %v2398_v17 }
 0x4ef   :  { %5265 = vmatpush1.msk.msra.mxu1 %vm490_vm3, %v2146_v29  ;;  %v5542_v39 = vpack.c.bf16 %v2011_v33, %v2005_v31  ;;  %v2387_v33 = vld [vmem:[#allocation2] ss:$2 sm:$0x3f] }
 0x4f0   :  { %v1966_v40 = vpop.f32.mrb[68].mxu0  ;;  %5525 = vmatprep.subr.bf16.mxu1 %v6088_v32  ;;  %5266 = vmatmul.mubr.msk.f32.vlgmr.msra.gmra.mrb[64].mxu1 %vm2152_vm5, %v6093_v35  ;;  %v5540_v41 = vpack.c.bf16 %v2012_v38, %v2006_v37  ;;  %v6119_v19 = vsub.s32 %v2399_v18, %v5900_v8 }
 0x4f1   :  { %v1968_v42 = vpop.f32.mrb[69].mxu0  ;;  %5527 = vmatpush1.bf16.msra.mxu1 %v6086_v27  ;;  %2309 = vmatprep.mubr.f32.mxu1 %v5815_v2  ;;  %v2017_v44 = vmax.f32 %v1966_v40, 0.0  ;;  %v2149_v27 = vld [vmem:[#allocation4 + $0x198] sm:$0x1] }
 0x4f2   :  { %5541 = vmatprep.subr.bf16.mxu0 %v5540_v41  ;;  %5529 = vmatprep.subr.bf16.mxu1 %v5528_v52  ;;  %v2018_v48 = vmax.f32 %v1968_v42, 0.0  ;;  %v2443_v42 = vld [vmem:[#allocation8 + $0xc8] sm:$0xff] }
 0x4f3   :  { %5543 = vmatpush1.bf16.msra.mxu0 %v5542_v39 }
 0x4f4   :  { %v1972_v43 = vpop.f32.mrb[70].mxu0 }
 0x4f5   :  { %v2023_v45 = vmax.f32 %v1972_v43, 0.0  ;;  %v1974_v46 = vpop.f32.mrb[71].mxu0  ;;  %5531 = vmatpush1.bf16.msra.mxu1 %v6090_v47  ;;  %v2148_v47 = vld [vmem:[#allocation4 + $0x190] sm:$0x1] }
 0x4f6   :  { %v2024_v32 = vmax.f32 %v1974_v46, 0.0  ;;  %5533 = vmatprep.subr.bf16.mxu1 %v5532_v12  ;;  %v2150_v12 = vld [vmem:[#allocation4 + $0x1a0] sm:$0x1]  ;;  %v2446_v46 = vld [vmem:[#allocation8 + $0xe0] sm:$0xff] }
 0x4f7   :  { %v5546_v49 = vpack.c.bf16 %v2023_v45, %v2017_v44  ;;  %v2444_v45 = vld [vmem:[#allocation8 + $0xd0] sm:$0xff] }
 0x4f8   :  { %v1978_v50 = vpop.f32.mrb[72].mxu0  ;;  %v5544_v51 = vpack.c.bf16 %v2024_v32, %v2018_v48 }
 0x4f9   :  { %v1980_v53 = vpop.f32.mrb[73].mxu0  ;;  %5535 = vmatpush1.bf16.msra.mxu1 %v5534_v5  ;;  %v2029_v54 = vmax.f32 %v1978_v50, 0.0 }
 0x4fa   :  { %5545 = vmatprep.subr.bf16.mxu0 %v5544_v51  ;;  %5537 = vmatprep.subr.bf16.mxu1 %v5536_v36  ;;  %v2030_v57 = vmax.f32 %v1980_v53, 0.0 }
 0x4fb   :  { %5547 = vmatpush1.bf16.msra.mxu0 %v5546_v49 }
 0x4fc   :  { %v1984_v52 = vpop.f32.mrb[74].mxu0 }
 0x4fd   :  { %v2035_v55 = vmax.f32 %v1984_v52, 0.0  ;;  %v1986_v56 = vpop.f32.mrb[75].mxu0  ;;  %5539 = vmatpush1.bf16.msra.mxu1 %v5538_v30 }
 0x4fe   :  { %v2036_v58 = vmax.f32 %v1986_v56, 0.0  ;;  %5267 = vmatprep.subr.msk.mxu1 %vm490_vm3, %v2149_v27 }
 0x4ff   :  { %v5550_v59 = vpack.c.bf16 %v2035_v55, %v2029_v54 }
 0x500   :  { %v1990_v60 = vpop.f32.mrb[76].mxu0  ;;  %v5548_v61 = vpack.c.bf16 %v2036_v58, %v2030_v57 }
 0x501   :  { %v1992_v62 = vpop.f32.mrb[77].mxu0  ;;  %5268 = vmatpush1.msk.msra.mxu1 %vm490_vm3, %v2148_v47  ;;  %v2041_v0 = vmax.f32 %v1990_v60, 0.0 }
 0x502   :  { %5269 = vmatmul.mubr.msk.f32.vlgmr.msra.gmra.mrb[66].mxu1 %vm2152_vm5, %v6093_v35  ;;  %5549 = vmatprep.subr.bf16.mxu0 %v5548_v61  ;;  %v2042_v5 = vmax.f32 %v1992_v62, 0.0 }
 0x503   :  { %5551 = vmatpush1.bf16.msra.mxu0 %v5550_v59  ;;  %2564 = vmatprep.mubr.f32.mxu1 %v5815_v2 }
 0x504   :  { %v1996_v63 = vpop.f32.mrb[78].mxu0 }
 0x505   :  { %v2047_v3 = vmax.f32 %v1996_v63, 0.0  ;;  %v1998_v4 = vpop.f32.mrb[79].mxu0 }
 0x506   :  { %v2048_v6 = vmax.f32 %v1998_v4, 0.0 }
 0x507   :  { %v5554_v7 = vpack.c.bf16 %v2047_v3, %v2041_v0 }
 0x508   :  { %v5552_v10 = vpack.c.bf16 %v2048_v6, %v2042_v5 }
 0x50a   :  { %5553 = vmatprep.subr.bf16.mxu0 %v5552_v10 }
 0x50b   :  { %5555 = vmatpush1.bf16.msra.mxu0 %v5554_v7 }
 0x50c   :  { %5270 = vmatprep.subr.msk.mxu0 %vm490_vm3, %v2151_v11 }
 0x50f   :  { %5271 = vmatpush1.msk.msra.mxu0 %vm490_vm3, %v2150_v12 }
 0x510   :  { %5272 = vmatmul.mubr.msk.f32.vlgmr.msra.gmra.mrb[80].mxu0 %vm2152_vm5, %v6093_v35 }
 0x511   :  { %2653 = vmatprep.mubr.f32.mxu0 %v5815_v2 }
 0x5c3   :  { %v6112_v13 = vpop.f32.mrb[64].mxu1 }
 0x5c4   :  { %v6114_v14 = vpop.f32.mrb[65].mxu1 }
 0x5c5   :  { %v2394_v15 = vcombine.low %v6112_v13, %v6114_v14 }
 0x5c7   :  { %v2403_v23 = vrot.slane %v2394_v15, %v6119_v19 }
 0x5d5   :  { %v6121_v20 = vpop.f32.mrb[66].mxu1 }
 0x5d6   :  { %v6123_v21 = vpop.f32.mrb[67].mxu1 }
 0x5d7   :  { %v2395_v22 = vcombine.low %v6121_v20, %v6123_v21 }
 0x5d9   :  { %v2410_v24 = vrot.slane %v2395_v22, %v6119_v19 }
 0x5db   :  { %v2418_v25 = vcombine.low %v2403_v23, %v2410_v24 }
 0x5dd   :  { %v2425_v30 = vrot.slane %v2418_v25, %v6119_v19 }
 0x5e3   :  { %v6129_v26 = vpop.f32.mrb[80].mxu0 }
 0x5e4   :  { %v6131_v28 = vpop.f32.mrb[81].mxu0 }
 0x5e5   :  { %v2396_v8 = vcombine.low %v6129_v26, %v6131_v28 }
 0x5e7   :  { %v2417_v29 = vrot.slane %v2396_v8, %v6119_v19 }
 0x5e9   :  { %v2432_v31 = vrot.slane %v2417_v29, %v6119_v19 }
 0x5eb   :  { %v2433_v34 = vcombine.low %v2425_v30, %v2432_v31  ;;  %v2844_v31 = vld [vmem:[#allocation3 + $0xc8] sm:$0x1] }
 0x5ed   :  { %v2435_v35 = vsub.f32 %v2387_v33, %v2433_v34 }
 0x5ef   :  { %2436 = vst.msk [vmem:[#allocation2] ss:$2 sm:$0x3f] %vm5882_vm0, %v2435_v35 }
 0x5f6   :  { %v2447_v36 = vld [vmem:[#allocation2] sm:$0xff]  ;;  %v5273_v41 = vld.sshfl [vmem:[#allocation2 + $0x8] sm:$0x33 pattern:$0x76325410] }
 0x5f7   :  { %v2458_v37 = vrot.slane %v2447_v36, %v5903_v9  ;;  %v2451_v38 = vcombine.high %v2447_v36, %v2447_v36  ;;  %v2475_v44 = vcombine.high %v5273_v41, %v5273_v41 }
 0x5f9   :  { %v2466_v39 = vcombine.high %v2458_v37, %v2458_v37  ;;  %v2465_v40 = vrot.slane %v2451_v38, %v5903_v9  ;;  %v2445_v9 = vld [vmem:[#allocation8 + $0xd8] sm:$0xff] }
 0x5fb   :  { %5274 = vmatprep.subr.msk.mxu1 %vm115_vm1, %v2466_v39  ;;  %v2467_v43 = vcombine.high %v2465_v40, %v2465_v40  ;;  %v2843_v39 = vld [vmem:[#allocation3 + $0xc0] sm:$0x1] }
 0x5fc   :  { %5275 = vmatpush1.msk.msra.mxu1 %vm115_vm1, %v2458_v37 }
 0x5fd   :  { %5276 = vmatmul.mubr.msk.f32.vlgmr.msra.gmra.mrb[68].mxu1 %vm102_vm2, %v2443_v42  ;;  %5280 = vmatprep.subr.msk.mxu0 %vm115_vm1, %v2467_v43  ;;  %v2815_v43 = vld [vmem:[#allocation8 + $0xe8] sm:$0xff] }
 0x5fe   :  { %5286 = vmatprep.subr.msk.mxu1 %vm115_vm1, %v2475_v44  ;;  %5281 = vmatpush1.msk.msra.mxu0 %vm115_vm1, %v2465_v40  ;;  %v2846_v40 = vld [vmem:[#allocation3 + $0xd8] sm:$0x1] }
 0x5ff   :  { %5287 = vmatpush1.msk.msra.mxu1 %vm115_vm1, %v5273_v41  ;;  %2570 = vmatprep.mubr.f32.mxu1 %v5815_v2 }
 0x600   :  { %5282 = vmatmul.mubr.msk.f32.vlgmr.msra.gmra.mrb[82].mxu0 %vm102_vm2, %v2443_v42 }
 0x601   :  { %5277 = vmatmul.mubr.msk.f32.gmra.mrb[70].mxu1 %vm102_vm2, %v2444_v45  ;;  %2659 = vmatprep.mubr.f32.mxu0 %v5815_v2 }
 0x602   :  { %2576 = vmatprep.mubr.f32.mxu1 %v5815_v2 }
 0x604   :  { %5283 = vmatmul.mubr.msk.f32.gmra.mrb[84].mxu0 %vm102_vm2, %v2444_v45 }
 0x605   :  { %5278 = vmatmul.mubr.msk.f32.gmra.mrb[72].mxu1 %vm102_vm2, %v2445_v9  ;;  %2665 = vmatprep.mubr.f32.mxu0 %v5815_v2 }
 0x606   :  { %2582 = vmatprep.mubr.f32.mxu1 %v5815_v2 }
 0x608   :  { %5284 = vmatmul.mubr.msk.f32.gmra.mrb[86].mxu0 %vm102_vm2, %v2445_v9 }
 0x609   :  { %5279 = vmatmul.mubr.msk.f32.gmra.mrb[74].mxu1 %vm102_vm2, %v2446_v46  ;;  %2671 = vmatprep.mubr.f32.mxu0 %v5815_v2 }
 0x60a   :  { %2742 = vmatprep.mubr.f32.mxu1 %v5815_v2 }
 0x60c   :  { %5285 = vmatmul.mubr.msk.f32.gmra.mrb[88].mxu0 %vm102_vm2, %v2446_v46 }
 0x60d   :  { %5288 = vmatmul.mubr.msk.f32.vlgmr.msra.gmra.mrb[76].mxu1 %vm102_vm2, %v2443_v42  ;;  %2943 = vmatprep.mubr.f32.mxu0 %v5815_v2 }
 0x60e   :  { %2748 = vmatprep.mubr.f32.mxu1 %v5815_v2 }
 0x611   :  { %5289 = vmatmul.mubr.msk.f32.gmra.mrb[78].mxu1 %vm102_vm2, %v2444_v45 }
 0x612   :  { %2754 = vmatprep.mubr.f32.mxu1 %v5815_v2 }
 0x615   :  { %5290 = vmatmul.mubr.msk.f32.gmra.mrb[80].mxu1 %vm102_vm2, %v2445_v9  ;;  %v2845_v9 = vld [vmem:[#allocation3 + $0xd0] sm:$0x1] }
 0x616   :  { %2760 = vmatprep.mubr.f32.mxu1 %v5815_v2 }
 0x619   :  { %5291 = vmatmul.mubr.msk.f32.gmra.mrb[82].mxu1 %vm102_vm2, %v2446_v46 }
 0x61a   :  { %3032 = vmatprep.mubr.f32.mxu1 %v5815_v2 }
 0x6d0   :  { %v2566_v48 = vpop.f32.mrb[68].mxu1 }
 0x6d1   :  { %v2568_v32 = vpop.f32.mrb[69].mxu1  ;;  %v2767_v53 = vmax.f32 %v2566_v48, 0.0 }
 0x6d2   :  { %v2768_v54 = vmax.f32 %v2568_v32, 0.0 }
 0x6d3   :  { %v2655_v49 = vpop.f32.mrb[82].mxu0 }
 0x6d4   :  { %v2572_v50 = vpop.f32.mrb[70].mxu1  ;;  %v2657_v51 = vpop.f32.mrb[83].mxu0  ;;  %v2769_v56 = vmax.f32 %v2655_v49, 0.0  ;;  %v2816_v49 = vld [vmem:[#allocation8 + $0xf0] sm:$0xff] }
 0x6d5   :  { %v2773_v27 = vmax.f32 %v2572_v50, 0.0  ;;  %v2574_v52 = vpop.f32.mrb[71].mxu1  ;;  %v2770_v58 = vmax.f32 %v2657_v51, 0.0 }
 0x6d6   :  { %v2774_v55 = vmax.f32 %v2574_v52, 0.0 }
 0x6d7   :  { %v5558_v57 = vpack.c.bf16 %v2773_v27, %v2767_v53  ;;  %v2661_v47 = vpop.f32.mrb[84].mxu0 }
 0x6d8   :  { %v2578_v59 = vpop.f32.mrb[72].mxu1  ;;  %v5556_v60 = vpack.c.bf16 %v2774_v55, %v2768_v54  ;;  %v2775_v61 = vmax.f32 %v2661_v47, 0.0  ;;  %v2663_v62 = vpop.f32.mrb[85].mxu0  ;;  %v2817_v54 = vld [vmem:[#allocation8 + $0xf8] sm:$0xff]  ;;  %v2848_v47 = vld [vmem:[#allocation3 + $0xe8] sm:$0x1] }
 0x6d9   :  { %v2580_v63 = vpop.f32.mrb[73].mxu1  ;;  %v2776_v0 = vmax.f32 %v2663_v62, 0.0  ;;  %v2779_v10 = vmax.f32 %v2578_v59, 0.0  ;;  %v2847_v59 = vld [vmem:[#allocation3 + $0xe0] sm:$0x1] }
 0x6da   :  { %5557 = vmatprep.subr.bf16.mxu0 %v5556_v60  ;;  %v5566_v3 = vpack.c.bf16 %v2775_v61, %v2769_v56  ;;  %v2780_v15 = vmax.f32 %v2580_v63, 0.0 }
 0x6db   :  { %5559 = vmatpush1.bf16.msra.mxu0 %v5558_v57  ;;  %v2667_v4 = vpop.f32.mrb[86].mxu0  ;;  %v5564_v5 = vpack.c.bf16 %v2776_v0, %v2770_v58  ;;  %v2818_v58 = vld [vmem:[#allocation8 + $0x100] sm:$0xff] }
 0x6dc   :  { %v2584_v6 = vpop.f32.mrb[74].mxu1  ;;  %v2669_v7 = vpop.f32.mrb[87].mxu0  ;;  %v2781_v17 = vmax.f32 %v2667_v4, 0.0 }
 0x6dd   :  { %v2785_v11 = vmax.f32 %v2584_v6, 0.0  ;;  %v2586_v12 = vpop.f32.mrb[75].mxu1  ;;  %5565 = vmatprep.subr.bf16.mxu1 %v5564_v5  ;;  %v2782_v22 = vmax.f32 %v2669_v7, 0.0 }
 0x6de   :  { %v2786_v16 = vmax.f32 %v2586_v12, 0.0  ;;  %5567 = vmatpush1.bf16.msra.mxu1 %v5566_v3 }
 0x6df   :  { %v5562_v18 = vpack.c.bf16 %v2785_v11, %v2779_v10  ;;  %v2673_v23 = vpop.f32.mrb[88].mxu0 }
 0x6e0   :  { %v2744_v24 = vpop.f32.mrb[76].mxu1  ;;  %v5560_v25 = vpack.c.bf16 %v2786_v16, %v2780_v15  ;;  %v2787_v8 = vmax.f32 %v2673_v23, 0.0  ;;  %v2675_v29 = vpop.f32.mrb[89].mxu0 }
 0x6e1   :  { %v2746_v30 = vpop.f32.mrb[77].mxu1  ;;  %v2788_v33 = vmax.f32 %v2675_v29, 0.0  ;;  %v2771_v35 = vmax.f32 %v2744_v24, 0.0 }
 0x6e2   :  { %5561 = vmatprep.subr.bf16.mxu0 %v5560_v25  ;;  %v5570_v34 = vpack.c.bf16 %v2787_v8, %v2781_v17  ;;  %v2772_v37 = vmax.f32 %v2746_v30, 0.0 }
 0x6e3   :  { %5563 = vmatpush1.bf16.msra.mxu0 %v5562_v18  ;;  %v5568_v36 = vpack.c.bf16 %v2788_v33, %v2782_v22 }
 0x6e4   :  { %v2750_v38 = vpop.f32.mrb[78].mxu1  ;;  %5292 = vmatprep.subr.msk.mxu0 %vm490_vm3, %v2844_v31 }
 0x6e5   :  { %v2777_v41 = vmax.f32 %v2750_v38, 0.0  ;;  %v2752_v42 = vpop.f32.mrb[79].mxu1  ;;  %5569 = vmatprep.subr.bf16.mxu1 %v5568_v36 }
 0x6e6   :  { %v2778_v44 = vmax.f32 %v2752_v42, 0.0  ;;  %5571 = vmatpush1.bf16.msra.mxu1 %v5570_v34 }
 0x6e7   :  { %5293 = vmatpush1.msk.msra.mxu0 %vm490_vm3, %v2843_v39  ;;  %v5574_v45 = vpack.c.bf16 %v2777_v41, %v2771_v35  ;;  %5298 = vmatprep.subr.msk.mxu1 %vm490_vm3, %v2846_v40 }
 0x6e8   :  { %v2756_v46 = vpop.f32.mrb[80].mxu1  ;;  %5294 = vmatmul.mubr.msk.f32.vlgmr.msra.gmra.mrb[90].mxu0 %vm477_vm4, %v2815_v43  ;;  %v5572_v48 = vpack.c.bf16 %v2778_v44, %v2772_v37 }
 0x6e9   :  { %v2758_v32 = vpop.f32.mrb[81].mxu1  ;;  %2949 = vmatprep.mubr.f32.mxu0 %v5815_v2  ;;  %v2783_v50 = vmax.f32 %v2756_v46, 0.0  ;;  %v3223_v46 = vld [vmem:[#allocation3 + $0xc8] sm:$0x1] }
 0x6ea   :  { %5573 = vmatprep.subr.bf16.mxu0 %v5572_v48  ;;  %5299 = vmatpush1.msk.msra.mxu1 %vm490_vm3, %v2845_v9  ;;  %v2784_v51 = vmax.f32 %v2758_v32, 0.0 }
 0x6eb   :  { %5575 = vmatpush1.bf16.msra.mxu0 %v5574_v45  ;;  %5300 = vmatmul.mubr.msk.f32.vlgmr.msra.gmra.mrb[84].mxu1 %vm477_vm4, %v2815_v43 }
 0x6ec   :  { %v2762_v53 = vpop.f32.mrb[82].mxu1  ;;  %5295 = vmatmul.mubr.msk.f32.gmra.mrb[92].mxu0 %vm477_vm4, %v2816_v49  ;;  %3038 = vmatprep.mubr.f32.mxu1 %v5815_v2 }
 0x6ed   :  { %v2789_v27 = vmax.f32 %v2762_v53, 0.0  ;;  %v2764_v52 = vpop.f32.mrb[83].mxu1  ;;  %2955 = vmatprep.mubr.f32.mxu0 %v5815_v2 }
 0x6ee   :  { %v2790_v55 = vmax.f32 %v2764_v52, 0.0  ;;  %v3225_v52 = vld [vmem:[#allocation3 + $0xd8] sm:$0x1] }
 0x6ef   :  { %v5578_v56 = vpack.c.bf16 %v2789_v27, %v2783_v50  ;;  %5301 = vmatmul.mubr.msk.f32.gmra.mrb[86].mxu1 %vm477_vm4, %v2816_v49  ;;  %v3222_v27 = vld [vmem:[#allocation3 + $0xc0] sm:$0x1] }
 0x6f0   :  { %5296 = vmatmul.mubr.msk.f32.gmra.mrb[94].mxu0 %vm477_vm4, %v2817_v54  ;;  %v5576_v57 = vpack.c.bf16 %v2790_v55, %v2784_v51  ;;  %3044 = vmatprep.mubr.f32.mxu1 %v5815_v2 }
 0x6f1   :  { %2961 = vmatprep.mubr.f32.mxu0 %v5815_v2 }
 0x6f2   :  { %5577 = vmatprep.subr.bf16.mxu0 %v5576_v57 }
 0x6f3   :  { %5579 = vmatpush1.bf16.msra.mxu0 %v5578_v56  ;;  %5302 = vmatmul.mubr.msk.f32.gmra.mrb[88].mxu1 %vm477_vm4, %v2817_v54  ;;  %v3194_v56 = vld [vmem:[#allocation8 + $0x108] sm:$0xff] }
 0x6f4   :  { %5297 = vmatmul.mubr.msk.f32.gmra.mrb[96].mxu0 %vm477_vm4, %v2818_v58  ;;  %5304 = vmatprep.subr.msk.mxu0 %vm490_vm3, %v2848_v47  ;;  %v3224_v47 = vld [vmem:[#allocation3 + $0xd0] sm:$0x1] }
 0x6f5   :  { %3121 = vmatprep.mubr.f32.mxu0 %v5815_v2  ;;  %3050 = vmatprep.mubr.f32.mxu1 %v5815_v2 }
 0x6f7   :  { %5305 = vmatpush1.msk.msra.mxu0 %vm490_vm3, %v2847_v59  ;;  %5303 = vmatmul.mubr.msk.f32.gmra.mrb[90].mxu1 %vm477_vm4, %v2818_v58 }
 0x6f8   :  { %5306 = vmatmul.mubr.msk.f32.vlgmr.msra.gmra.mrb[98].mxu0 %vm477_vm4, %v2815_v43  ;;  %3322 = vmatprep.mubr.f32.mxu1 %v5815_v2 }
 0x6f9   :  { %3127 = vmatprep.mubr.f32.mxu0 %v5815_v2 }
 0x6fc   :  { %5307 = vmatmul.mubr.msk.f32.gmra.mrb[100].mxu0 %vm477_vm4, %v2816_v49 }
 0x6fd   :  { %3133 = vmatprep.mubr.f32.mxu0 %v5815_v2 }
 0x700   :  { %5308 = vmatmul.mubr.msk.f32.gmra.mrb[102].mxu0 %vm477_vm4, %v2817_v54 }
 0x701   :  { %3139 = vmatprep.mubr.f32.mxu0 %v5815_v2 }
 0x704   :  { %5309 = vmatmul.mubr.msk.f32.gmra.mrb[104].mxu0 %vm477_vm4, %v2818_v58 }
 0x705   :  { %3411 = vmatprep.mubr.f32.mxu0 %v5815_v2 }
 0x7bb   :  { %v2945_v60 = vpop.f32.mrb[90].mxu0 }
 0x7bc   :  { %v2947_v61 = vpop.f32.mrb[91].mxu0  ;;  %v3146_v3 = vmax.f32 %v2945_v60, 0.0 }
 0x7bd   :  { %v3147_v6 = vmax.f32 %v2947_v61, 0.0 }
 0x7be   :  { %v3034_v62 = vpop.f32.mrb[84].mxu1 }
 0x7bf   :  { %v2951_v63 = vpop.f32.mrb[92].mxu0  ;;  %v3036_v0 = vpop.f32.mrb[85].mxu1  ;;  %v3148_v10 = vmax.f32 %v3034_v62, 0.0  ;;  %v3195_v62 = vld [vmem:[#allocation8 + $0x110] sm:$0xff] }
 0x7c0   :  { %v3152_v4 = vmax.f32 %v2951_v63, 0.0  ;;  %v2953_v5 = vpop.f32.mrb[93].mxu0  ;;  %v3149_v12 = vmax.f32 %v3036_v0, 0.0 }
 0x7c1   :  { %v3153_v7 = vmax.f32 %v2953_v5, 0.0 }
 0x7c2   :  { %v5582_v11 = vpack.c.bf16 %v3152_v4, %v3146_v3  ;;  %v3040_v15 = vpop.f32.mrb[86].mxu1 }
 0x7c3   :  { %v2957_v16 = vpop.f32.mrb[94].mxu0  ;;  %v5580_v17 = vpack.c.bf16 %v3153_v7, %v3147_v6  ;;  %v3154_v18 = vmax.f32 %v3040_v15, 0.0  ;;  %v3042_v22 = vpop.f32.mrb[87].mxu1  ;;  %v3196_v6 = vld [vmem:[#allocation8 + $0x118] sm:$0xff]  ;;  %v3227_v15 = vld [vmem:[#allocation3 + $0xe8] sm:$0x1] }
 0x7c4   :  { %v2959_v23 = vpop.f32.mrb[95].mxu0  ;;  %v3155_v24 = vmax.f32 %v3042_v22, 0.0  ;;  %v3158_v33 = vmax.f32 %v2957_v16, 0.0  ;;  %v3226_v16 = vld [vmem:[#allocation3 + $0xe0] sm:$0x1] }
 0x7c5   :  { %5581 = vmatprep.subr.bf16.mxu1 %v5580_v17  ;;  %v5590_v25 = vpack.c.bf16 %v3154_v18, %v3148_v10  ;;  %v3159_v36 = vmax.f32 %v2959_v23, 0.0 }
 0x7c6   :  { %5583 = vmatpush1.bf16.msra.mxu1 %v5582_v11  ;;  %v3046_v8 = vpop.f32.mrb[88].mxu1  ;;  %v5588_v29 = vpack.c.bf16 %v3155_v24, %v3149_v12  ;;  %v3197_v12 = vld [vmem:[#allocation8 + $0x120] sm:$0xff] }
 0x7c7   :  { %v2963_v30 = vpop.f32.mrb[96].mxu0  ;;  %v3048_v31 = vpop.f32.mrb[89].mxu1  ;;  %v3160_v38 = vmax.f32 %v3046_v8, 0.0 }
 0x7c8   :  { %v3164_v34 = vmax.f32 %v2963_v30, 0.0  ;;  %v2965_v35 = vpop.f32.mrb[97].mxu0  ;;  %5589 = vmatprep.subr.bf16.mxu0 %v5588_v29  ;;  %v3161_v40 = vmax.f32 %v3048_v31, 0.0 }
 0x7c9   :  { %v3165_v37 = vmax.f32 %v2965_v35, 0.0  ;;  %5591 = vmatpush1.bf16.msra.mxu0 %v5590_v25 }
 0x7ca   :  { %v5586_v39 = vpack.c.bf16 %v3164_v34, %v3158_v33  ;;  %v3052_v41 = vpop.f32.mrb[90].mxu1 }
 0x7cb   :  { %v3123_v42 = vpop.f32.mrb[98].mxu0  ;;  %v5584_v43 = vpack.c.bf16 %v3165_v37, %v3159_v36  ;;  %v3166_v44 = vmax.f32 %v3052_v41, 0.0  ;;  %v3054_v45 = vpop.f32.mrb[91].mxu1 }
 0x7cc   :  { %v3125_v9 = vpop.f32.mrb[99].mxu0  ;;  %v3167_v48 = vmax.f32 %v3054_v45, 0.0  ;;  %v3150_v49 = vmax.f32 %v3123_v42, 0.0 }
 0x7cd   :  { %5585 = vmatprep.subr.bf16.mxu1 %v5584_v43  ;;  %v5594_v32 = vpack.c.bf16 %v3166_v44, %v3160_v38  ;;  %v3151_v51 = vmax.f32 %v3125_v9, 0.0 }
 0x7ce   :  { %5587 = vmatpush1.bf16.msra.mxu1 %v5586_v39  ;;  %v5592_v50 = vpack.c.bf16 %v3167_v48, %v3161_v40 }
 0x7cf   :  { %v3129_v53 = vpop.f32.mrb[100].mxu0  ;;  %5310 = vmatprep.subr.msk.mxu1 %vm490_vm3, %v3223_v46 }
 0x7d0   :  { %v3156_v54 = vmax.f32 %v3129_v53, 0.0  ;;  %v3131_v55 = vpop.f32.mrb[101].mxu0  ;;  %5593 = vmatprep.subr.bf16.mxu0 %v5592_v50 }
 0x7d1   :  { %v3157_v57 = vmax.f32 %v3131_v55, 0.0  ;;  %5595 = vmatpush1.bf16.msra.mxu0 %v5594_v32 }
 0x7d2   :  { %5311 = vmatpush1.msk.msra.mxu1 %vm490_vm3, %v3222_v27  ;;  %v5598_v58 = vpack.c.bf16 %v3156_v54, %v3150_v49  ;;  %5316 = vmatprep.subr.msk.mxu0 %vm490_vm3, %v3225_v52 }
 0x7d3   :  { %v3135_v59 = vpop.f32.mrb[102].mxu0  ;;  %5312 = vmatmul.mubr.msk.f32.vlgmr.msra.gmra.mrb[92].mxu1 %vm477_vm4, %v3194_v56  ;;  %v5596_v60 = vpack.c.bf16 %v3157_v57, %v3151_v51 }
 0x7d4   :  { %v3137_v61 = vpop.f32.mrb[103].mxu0  ;;  %3328 = vmatprep.mubr.f32.mxu1 %v5815_v2  ;;  %v3162_v63 = vmax.f32 %v3135_v59, 0.0  ;;  %v3602_v59 = vld [vmem:[#allocation3 + $0xc8] sm:$0x1] }
 0x7d5   :  { %5597 = vmatprep.subr.bf16.mxu1 %v5596_v60  ;;  %5317 = vmatpush1.msk.msra.mxu0 %vm490_vm3, %v3224_v47  ;;  %v3163_v0 = vmax.f32 %v3137_v61, 0.0 }
 0x7d6   :  { %5599 = vmatpush1.bf16.msra.mxu1 %v5598_v58  ;;  %5318 = vmatmul.mubr.msk.f32.vlgmr.msra.gmra.mrb[106].mxu0 %vm477_vm4, %v3194_v56 }
 0x7d7   :  { %v3141_v3 = vpop.f32.mrb[104].mxu0  ;;  %5313 = vmatmul.mubr.msk.f32.gmra.mrb[94].mxu1 %vm477_vm4, %v3195_v62  ;;  %3417 = vmatprep.mubr.f32.mxu0 %v5815_v2 }
 0x7d8   :  { %v3168_v4 = vmax.f32 %v3141_v3, 0.0  ;;  %v3143_v5 = vpop.f32.mrb[105].mxu0  ;;  %3334 = vmatprep.mubr.f32.mxu1 %v5815_v2 }
 0x7d9   :  { %v3169_v7 = vmax.f32 %v3143_v5, 0.0  ;;  %v3604_v5 = vld [vmem:[#allocation3 + $0xd8] sm:$0x1] }
 0x7da   :  { %v5602_v10 = vpack.c.bf16 %v3168_v4, %v3162_v63  ;;  %5319 = vmatmul.mubr.msk.f32.gmra.mrb[108].mxu0 %vm477_vm4, %v3195_v62  ;;  %v3601_v4 = vld [vmem:[#allocation3 + $0xc0] sm:$0x1] }
 0x7db   :  { %5314 = vmatmul.mubr.msk.f32.gmra.mrb[96].mxu1 %vm477_vm4, %v3196_v6  ;;  %v5600_v11 = vpack.c.bf16 %v3169_v7, %v3163_v0  ;;  %3423 = vmatprep.mubr.f32.mxu0 %v5815_v2 }
 0x7dc   :  { %3340 = vmatprep.mubr.f32.mxu1 %v5815_v2 }
 0x7dd   :  { %5601 = vmatprep.subr.bf16.mxu1 %v5600_v11 }
 0x7de   :  { %5603 = vmatpush1.bf16.msra.mxu1 %v5602_v10  ;;  %5320 = vmatmul.mubr.msk.f32.gmra.mrb[110].mxu0 %vm477_vm4, %v3196_v6  ;;  %v3573_v10 = vld [vmem:[#allocation8 + $0x128] sm:$0xff] }
 0x7df   :  { %5315 = vmatmul.mubr.msk.f32.gmra.mrb[98].mxu1 %vm477_vm4, %v3197_v12  ;;  %5322 = vmatprep.subr.msk.mxu1 %vm490_vm3, %v3227_v15  ;;  %v3603_v15 = vld [vmem:[#allocation3 + $0xd0] sm:$0x1] }
 0x7e0   :  { %3500 = vmatprep.mubr.f32.mxu1 %v5815_v2  ;;  %3429 = vmatprep.mubr.f32.mxu0 %v5815_v2 }
 0x7e2   :  { %5323 = vmatpush1.msk.msra.mxu1 %vm490_vm3, %v3226_v16  ;;  %5321 = vmatmul.mubr.msk.f32.gmra.mrb[112].mxu0 %vm477_vm4, %v3197_v12 }
 0x7e3   :  { %5324 = vmatmul.mubr.msk.f32.vlgmr.msra.gmra.mrb[100].mxu1 %vm477_vm4, %v3194_v56  ;;  %3701 = vmatprep.mubr.f32.mxu0 %v5815_v2 }
 0x7e4   :  { %3506 = vmatprep.mubr.f32.mxu1 %v5815_v2 }
 0x7e7   :  { %5325 = vmatmul.mubr.msk.f32.gmra.mrb[102].mxu1 %vm477_vm4, %v3195_v62 }
 0x7e8   :  { %3512 = vmatprep.mubr.f32.mxu1 %v5815_v2 }
 0x7eb   :  { %5326 = vmatmul.mubr.msk.f32.gmra.mrb[104].mxu1 %vm477_vm4, %v3196_v6 }
 0x7ec   :  { %3518 = vmatprep.mubr.f32.mxu1 %v5815_v2 }
 0x7ef   :  { %5327 = vmatmul.mubr.msk.f32.gmra.mrb[106].mxu1 %vm477_vm4, %v3197_v12 }
 0x7f0   :  { %3790 = vmatprep.mubr.f32.mxu1 %v5815_v2 }
 0x8a6   :  { %v3324_v17 = vpop.f32.mrb[92].mxu1 }
 0x8a7   :  { %v3326_v18 = vpop.f32.mrb[93].mxu1  ;;  %v3525_v25 = vmax.f32 %v3324_v17, 0.0 }
 0x8a8   :  { %v3526_v30 = vmax.f32 %v3326_v18, 0.0 }
 0x8a9   :  { %v3413_v22 = vpop.f32.mrb[106].mxu0 }
 0x8aa   :  { %v3330_v23 = vpop.f32.mrb[94].mxu1  ;;  %v3415_v24 = vpop.f32.mrb[107].mxu0  ;;  %v3527_v33 = vmax.f32 %v3413_v22, 0.0  ;;  %v3574_v22 = vld [vmem:[#allocation8 + $0x130] sm:$0xff] }
 0x8ab   :  { %v3531_v8 = vmax.f32 %v3330_v23, 0.0  ;;  %v3332_v29 = vpop.f32.mrb[95].mxu1  ;;  %v3528_v35 = vmax.f32 %v3415_v24, 0.0 }
 0x8ac   :  { %v3532_v31 = vmax.f32 %v3332_v29, 0.0 }
 0x8ad   :  { %v5606_v34 = vpack.c.bf16 %v3531_v8, %v3525_v25  ;;  %v3419_v36 = vpop.f32.mrb[108].mxu0 }
 0x8ae   :  { %v3336_v37 = vpop.f32.mrb[96].mxu1  ;;  %v5604_v38 = vpack.c.bf16 %v3532_v31, %v3526_v30  ;;  %v3533_v39 = vmax.f32 %v3419_v36, 0.0  ;;  %v3421_v40 = vpop.f32.mrb[109].mxu0  ;;  %v3575_v30 = vld [vmem:[#allocation8 + $0x138] sm:$0xff]  ;;  %v3606_v36 = vld [vmem:[#allocation3 + $0xe8] sm:$0x1] }
 0x8af   :  { %v3338_v41 = vpop.f32.mrb[97].mxu1  ;;  %v3534_v42 = vmax.f32 %v3421_v40, 0.0  ;;  %v3537_v48 = vmax.f32 %v3336_v37, 0.0  ;;  %v3605_v37 = vld [vmem:[#allocation3 + $0xe0] sm:$0x1] }
 0x8b0   :  { %5605 = vmatprep.subr.bf16.mxu0 %v5604_v38  ;;  %v5614_v43 = vpack.c.bf16 %v3533_v39, %v3527_v33  ;;  %v3538_v50 = vmax.f32 %v3338_v41, 0.0 }
 0x8b1   :  { %5607 = vmatpush1.bf16.msra.mxu0 %v5606_v34  ;;  %v3425_v44 = vpop.f32.mrb[110].mxu0  ;;  %v5612_v45 = vpack.c.bf16 %v3534_v42, %v3528_v35  ;;  %v3576_v35 = vld [vmem:[#allocation8 + $0x140] sm:$0xff] }
 0x8b2   :  { %v3342_v9 = vpop.f32.mrb[98].mxu1  ;;  %v3427_v46 = vpop.f32.mrb[111].mxu0  ;;  %v3539_v53 = vmax.f32 %v3425_v44, 0.0 }
 0x8b3   :  { %v3543_v32 = vmax.f32 %v3342_v9, 0.0  ;;  %v3344_v49 = vpop.f32.mrb[99].mxu1  ;;  %5613 = vmatprep.subr.bf16.mxu1 %v5612_v45  ;;  %v3540_v52 = vmax.f32 %v3427_v46, 0.0 }
 0x8b4   :  { %v3544_v51 = vmax.f32 %v3344_v49, 0.0  ;;  %5615 = vmatpush1.bf16.msra.mxu1 %v5614_v43 }
 0x8b5   :  { %v5610_v27 = vpack.c.bf16 %v3543_v32, %v3537_v48  ;;  %v3431_v54 = vpop.f32.mrb[112].mxu0 }
 0x8b6   :  { %v3502_v55 = vpop.f32.mrb[100].mxu1  ;;  %v5608_v56 = vpack.c.bf16 %v3544_v51, %v3538_v50  ;;  %v3545_v57 = vmax.f32 %v3431_v54, 0.0  ;;  %v3433_v58 = vpop.f32.mrb[113].mxu0 }
 0x8b7   :  { %v3504_v47 = vpop.f32.mrb[101].mxu1  ;;  %v3546_v60 = vmax.f32 %v3433_v58, 0.0  ;;  %v3529_v62 = vmax.f32 %v3502_v55, 0.0 }
 0x8b8   :  { %5609 = vmatprep.subr.bf16.mxu0 %v5608_v56  ;;  %v5618_v61 = vpack.c.bf16 %v3545_v57, %v3539_v53  ;;  %v3530_v0 = vmax.f32 %v3504_v47, 0.0 }
 0x8b9   :  { %5611 = vmatpush1.bf16.msra.mxu0 %v5610_v27  ;;  %v5616_v63 = vpack.c.bf16 %v3546_v60, %v3540_v52 }
 0x8ba   :  { %v3508_v3 = vpop.f32.mrb[102].mxu1  ;;  %5328 = vmatprep.subr.msk.mxu0 %vm490_vm3, %v3602_v59 }
 0x8bb   :  { %v3535_v6 = vmax.f32 %v3508_v3, 0.0  ;;  %v3510_v7 = vpop.f32.mrb[103].mxu1  ;;  %5617 = vmatprep.subr.bf16.mxu1 %v5616_v63 }
 0x8bc   :  { %v3536_v11 = vmax.f32 %v3510_v7, 0.0  ;;  %5619 = vmatpush1.bf16.msra.mxu1 %v5618_v61 }
 0x8bd   :  { %5329 = vmatpush1.msk.msra.mxu0 %vm490_vm3, %v3601_v4  ;;  %v5622_v12 = vpack.c.bf16 %v3535_v6, %v3529_v62  ;;  %5334 = vmatprep.subr.msk.mxu1 %vm490_vm3, %v3604_v5 }
 0x8be   :  { %v3514_v16 = vpop.f32.mrb[104].mxu1  ;;  %5330 = vmatmul.mubr.msk.f32.vlgmr.msra.gmra.mrb[114].mxu0 %vm477_vm4, %v3573_v10  ;;  %v5620_v17 = vpack.c.bf16 %v3536_v11, %v3530_v0 }
 0x8bf   :  { %v3516_v18 = vpop.f32.mrb[105].mxu1  ;;  %3707 = vmatprep.mubr.f32.mxu0 %v5815_v2  ;;  %v3541_v23 = vmax.f32 %v3514_v16, 0.0 }
 0x8c0   :  { %5621 = vmatprep.subr.bf16.mxu0 %v5620_v17  ;;  %5335 = vmatpush1.msk.msra.mxu1 %vm490_vm3, %v3603_v15  ;;  %v3542_v24 = vmax.f32 %v3516_v18, 0.0  ;;  %v3985_v17 = vld [vmem:[#allocation3 + $0xc8] sm:$0x1] }
 0x8c1   :  { %5623 = vmatpush1.bf16.msra.mxu0 %v5622_v12  ;;  %5336 = vmatmul.mubr.msk.f32.vlgmr.msra.gmra.mrb[108].mxu1 %vm477_vm4, %v3573_v10 }
 0x8c2   :  { %v3520_v25 = vpop.f32.mrb[106].mxu1  ;;  %5331 = vmatmul.mubr.msk.f32.gmra.mrb[116].mxu0 %vm477_vm4, %v3574_v22  ;;  %3796 = vmatprep.mubr.f32.mxu1 %v5815_v2 }
 0x8c3   :  { %v3547_v8 = vmax.f32 %v3520_v25, 0.0  ;;  %v3522_v29 = vpop.f32.mrb[107].mxu1  ;;  %3713 = vmatprep.mubr.f32.mxu0 %v5815_v2 }
 0x8c4   :  { %v3548_v31 = vmax.f32 %v3522_v29, 0.0  ;;  %v3987_v29 = vld [vmem:[#allocation3 + $0xd8] sm:$0x1] }
 0x8c5   :  { %v5626_v33 = vpack.c.bf16 %v3547_v8, %v3541_v23  ;;  %5337 = vmatmul.mubr.msk.f32.gmra.mrb[110].mxu1 %vm477_vm4, %v3574_v22  ;;  %v3984_v8 = vld [vmem:[#allocation3 + $0xc0] sm:$0x1] }
 0x8c6   :  { %5332 = vmatmul.mubr.msk.f32.gmra.mrb[118].mxu0 %vm477_vm4, %v3575_v30  ;;  %v5624_v34 = vpack.c.bf16 %v3548_v31, %v3542_v24  ;;  %3802 = vmatprep.mubr.f32.mxu1 %v5815_v2 }
 0x8c7   :  { %3719 = vmatprep.mubr.f32.mxu0 %v5815_v2 }
 0x8c8   :  { %5625 = vmatprep.subr.bf16.mxu0 %v5624_v34 }
 0x8c9   :  { %5627 = vmatpush1.bf16.msra.mxu0 %v5626_v33  ;;  %5338 = vmatmul.mubr.msk.f32.gmra.mrb[112].mxu1 %vm477_vm4, %v3575_v30  ;;  %v6263_v33 = vld [vmem:[#allocation8 + $0x148] sm:$0xff] }
 0x8ca   :  { %5333 = vmatmul.mubr.msk.f32.gmra.mrb[120].mxu0 %vm477_vm4, %v3576_v35  ;;  %5340 = vmatprep.subr.msk.mxu0 %vm490_vm3, %v3606_v36  ;;  %v3986_v36 = vld [vmem:[#allocation3 + $0xd0] sm:$0x1] }
 0x8cb   :  { %3879 = vmatprep.mubr.f32.mxu0 %v5815_v2  ;;  %3808 = vmatprep.mubr.f32.mxu1 %v5815_v2 }
 0x8cd   :  { %5341 = vmatpush1.msk.msra.mxu0 %vm490_vm3, %v3605_v37  ;;  %5339 = vmatmul.mubr.msk.f32.gmra.mrb[114].mxu1 %vm477_vm4, %v3576_v35 }
 0x8ce   :  { %5342 = vmatmul.mubr.msk.f32.vlgmr.msra.gmra.mrb[122].mxu0 %vm477_vm4, %v3573_v10  ;;  %4096 = vmatprep.mubr.f32.mxu1 %v5815_v2 }
 0x8cf   :  { %3885 = vmatprep.mubr.f32.mxu0 %v5815_v2 }
 0x8d2   :  { %5343 = vmatmul.mubr.msk.f32.gmra.mrb[124].mxu0 %vm477_vm4, %v3574_v22 }
 0x8d3   :  { %3891 = vmatprep.mubr.f32.mxu0 %v5815_v2 }
 0x8d6   :  { %5344 = vmatmul.mubr.msk.f32.gmra.mrb[126].mxu0 %vm477_vm4, %v3575_v30 }
 0x8d7   :  { %3897 = vmatprep.mubr.f32.mxu0 %v5815_v2 }
 0x8da   :  { %5345 = vmatmul.mubr.msk.f32.gmra.mrb[128].mxu0 %vm477_vm4, %v3576_v35 }
 0x8db   :  { %4209 = vmatprep.mubr.f32.mxu0 %v5815_v2 }
 0x991   :  { %v3703_v38 = vpop.f32.mrb[114].mxu0 }
 0x992   :  { %v3904_v39 = vmax.f32 %v3703_v38, 0.0  ;;  %v3705_v40 = vpop.f32.mrb[115].mxu0 }
 0x993   :  { %v3905_v41 = vmax.f32 %v3705_v40, 0.0 }
 0x994   :  { %v3792_v42 = vpop.f32.mrb[108].mxu1 }
 0x995   :  { %v3709_v43 = vpop.f32.mrb[116].mxu0  ;;  %v3906_v44 = vmax.f32 %v3792_v42, 0.0  ;;  %v3794_v45 = vpop.f32.mrb[109].mxu1 }
 0x996   :  { %v3910_v9 = vmax.f32 %v3709_v43, 0.0  ;;  %v3711_v46 = vpop.f32.mrb[117].mxu0  ;;  %v3907_v48 = vmax.f32 %v3794_v45, 0.0 }
 0x997   :  { %v3911_v32 = vmax.f32 %v3711_v46, 0.0 }
 0x998   :  { %v5630_v49 = vpack.c.bf16 %v3910_v9, %v3904_v39  ;;  %v3798_v50 = vpop.f32.mrb[110].mxu1  ;;  %v3954_v9 = vld [vmem:[#allocation8 + $0x158] sm:$0xff] }
 0x999   :  { %v3715_v51 = vpop.f32.mrb[118].mxu0  ;;  %v5628_v53 = vpack.c.bf16 %v3911_v32, %v3905_v41  ;;  %v3912_v27 = vmax.f32 %v3798_v50, 0.0  ;;  %v3800_v52 = vpop.f32.mrb[111].mxu1  ;;  %v3953_v41 = vld [vmem:[#allocation8 + $0x150] sm:$0xff]  ;;  %v3989_v50 = vld [vmem:[#allocation3 + $0xe8] sm:$0x1] }
 0x99a   :  { %v3916_v54 = vmax.f32 %v3715_v51, 0.0  ;;  %v3717_v55 = vpop.f32.mrb[119].mxu0  ;;  %v3913_v56 = vmax.f32 %v3800_v52, 0.0  ;;  %v3988_v51 = vld [vmem:[#allocation3 + $0xe0] sm:$0x1] }
 0x99b   :  { %v3917_v57 = vmax.f32 %v3717_v55, 0.0  ;;  %5629 = vmatprep.subr.bf16.mxu1 %v5628_v53  ;;  %v5638_v58 = vpack.c.bf16 %v3912_v27, %v3906_v44  ;;  %v3956_v53 = vld [vmem:[#allocation8 + $0x168] sm:$0xff]  ;;  %v3957_v27 = vld [vmem:[#allocation8 + $0x170] sm:$0xff]  ;;  %v3958_v52 = vld [vmem:[#allocation8 + $0x178] sm:$0xff] }
 0x99c   :  { %5631 = vmatpush1.bf16.msra.mxu1 %v5630_v49  ;;  %v3804_v47 = vpop.f32.mrb[112].mxu1  ;;  %v5636_v59 = vpack.c.bf16 %v3913_v56, %v3907_v48  ;;  %v3955_v49 = vld [vmem:[#allocation8 + $0x160] sm:$0xff] }
 0x99d   :  { %v3721_v60 = vpop.f32.mrb[120].mxu0  ;;  %v3918_v61 = vmax.f32 %v3804_v47, 0.0  ;;  %v3806_v62 = vpop.f32.mrb[113].mxu1 }
 0x99e   :  { %v3922_v63 = vmax.f32 %v3721_v60, 0.0  ;;  %v3723_v0 = vpop.f32.mrb[121].mxu0  ;;  %v3919_v3 = vmax.f32 %v3806_v62, 0.0  ;;  %5637 = vmatprep.subr.bf16.mxu0 %v5636_v59 }
 0x99f   :  { %v3923_v4 = vmax.f32 %v3723_v0, 0.0  ;;  %5639 = vmatpush1.bf16.msra.mxu0 %v5638_v58 }
 0x9a0   :  { %v5634_v5 = vpack.c.bf16 %v3922_v63, %v3916_v54  ;;  %v3810_v6 = vpop.f32.mrb[114].mxu1  ;;  %v3959_v54 = vld [vmem:[#allocation8 + $0x180] sm:$0xff] }
 0x9a1   :  { %v3881_v7 = vpop.f32.mrb[122].mxu0  ;;  %v5632_v10 = vpack.c.bf16 %v3923_v4, %v3917_v57  ;;  %v3924_v11 = vmax.f32 %v3810_v6, 0.0  ;;  %v3812_v12 = vpop.f32.mrb[115].mxu1 }
 0x9a2   :  { %v3908_v15 = vmax.f32 %v3881_v7, 0.0  ;;  %v3883_v16 = vpop.f32.mrb[123].mxu0  ;;  %v3925_v18 = vmax.f32 %v3812_v12, 0.0 }
 0x9a3   :  { %v3909_v22 = vmax.f32 %v3883_v16, 0.0  ;;  %5633 = vmatprep.subr.bf16.mxu1 %v5632_v10  ;;  %v5642_v23 = vpack.c.bf16 %v3924_v11, %v3918_v61 }
 0x9a4   :  { %5635 = vmatpush1.bf16.msra.mxu1 %v5634_v5  ;;  %v5640_v24 = vpack.c.bf16 %v3925_v18, %v3919_v3 }
 0x9a5   :  { %v3887_v25 = vpop.f32.mrb[124].mxu0  ;;  %5346 = vmatprep.subr.msk.mxu1 %vm490_vm3, %v3985_v17 }
 0x9a6   :  { %v3914_v30 = vmax.f32 %v3887_v25, 0.0  ;;  %v3889_v31 = vpop.f32.mrb[125].mxu0  ;;  %5641 = vmatprep.subr.bf16.mxu0 %v5640_v24 }
 0x9a7   :  { %v3915_v34 = vmax.f32 %v3889_v31, 0.0  ;;  %5643 = vmatpush1.bf16.msra.mxu0 %v5642_v23 }
 0x9a8   :  { %5347 = vmatpush1.msk.msra.mxu1 %vm490_vm3, %v3984_v8  ;;  %v5646_v35 = vpack.c.bf16 %v3914_v30, %v3908_v15  ;;  %5356 = vmatprep.subr.msk.mxu0 %vm490_vm3, %v3987_v29 }
 0x9a9   :  { %v3893_v37 = vpop.f32.mrb[126].mxu0  ;;  %5348 = vmatmul.mubr.msk.f32.vlgmr.msra.gmra.mrb[116].mxu1 %vm477_vm4, %v6263_v33  ;;  %v5644_v38 = vpack.c.bf16 %v3915_v34, %v3909_v22 }
 0x9aa   :  { %v3920_v39 = vmax.f32 %v3893_v37, 0.0  ;;  %v3895_v40 = vpop.f32.mrb[127].mxu0  ;;  %4102 = vmatprep.mubr.f32.mxu1 %v5815_v2 }
 0x9ab   :  { %v3921_v42 = vmax.f32 %v3895_v40, 0.0  ;;  %5645 = vmatprep.subr.bf16.mxu1 %v5644_v38  ;;  %5357 = vmatpush1.msk.msra.mxu0 %vm490_vm3, %v3986_v36 }
 0x9ac   :  { %5647 = vmatpush1.bf16.msra.mxu1 %v5646_v35  ;;  %5358 = vmatmul.mubr.msk.f32.vlgmr.msra.gmra.mrb[130].mxu0 %vm477_vm4, %v6263_v33 }
 0x9ad   :  { %v3899_v43 = vpop.f32.mrb[128].mxu0  ;;  %5349 = vmatmul.mubr.msk.f32.gmra.mrb[118].mxu1 %vm477_vm4, %v3953_v41  ;;  %4215 = vmatprep.mubr.f32.mxu0 %v5815_v2 }
 0x9ae   :  { %v3926_v44 = vmax.f32 %v3899_v43, 0.0  ;;  %v3901_v45 = vpop.f32.mrb[129].mxu0  ;;  %4108 = vmatprep.mubr.f32.mxu1 %v5815_v2 }
 0x9af   :  { %v3927_v46 = vmax.f32 %v3901_v45, 0.0 }
 0x9b0   :  { %v5650_v48 = vpack.c.bf16 %v3926_v44, %v3920_v39  ;;  %5359 = vmatmul.mubr.msk.f32.gmra.mrb[132].mxu0 %vm477_vm4, %v3953_v41 }
 0x9b1   :  { %5350 = vmatmul.mubr.msk.f32.gmra.mrb[120].mxu1 %vm477_vm4, %v3954_v9  ;;  %v5648_v32 = vpack.c.bf16 %v3927_v46, %v3921_v42  ;;  %4221 = vmatprep.mubr.f32.mxu0 %v5815_v2 }
 0x9b2   :  { %4114 = vmatprep.mubr.f32.mxu1 %v5815_v2 }
 0x9b3   :  { %5649 = vmatprep.subr.bf16.mxu1 %v5648_v32 }
 0x9b4   :  { %5651 = vmatpush1.bf16.msra.mxu1 %v5650_v48  ;;  %5360 = vmatmul.mubr.msk.f32.gmra.mrb[134].mxu0 %vm477_vm4, %v3954_v9 }
 0x9b5   :  { %5351 = vmatmul.mubr.msk.f32.gmra.mrb[122].mxu1 %vm477_vm4, %v3955_v49  ;;  %5366 = vmatprep.subr.msk.mxu1 %vm490_vm3, %v3989_v50 }
 0x9b6   :  { %4120 = vmatprep.mubr.f32.mxu1 %v5815_v2  ;;  %4227 = vmatprep.mubr.f32.mxu0 %v5815_v2 }
 0x9b8   :  { %5367 = vmatpush1.msk.msra.mxu1 %vm490_vm3, %v3988_v51  ;;  %5361 = vmatmul.mubr.msk.f32.gmra.mrb[136].mxu0 %vm477_vm4, %v3955_v49 }
 0x9b9   :  { %5352 = vmatmul.mubr.msk.f32.gmra.mrb[124].mxu1 %vm477_vm4, %v3956_v53  ;;  %4233 = vmatprep.mubr.f32.mxu0 %v5815_v2 }
 0x9ba   :  { %4126 = vmatprep.mubr.f32.mxu1 %v5815_v2 }
 0x9bc   :  { %5362 = vmatmul.mubr.msk.f32.gmra.mrb[138].mxu0 %vm477_vm4, %v3956_v53 }
 0x9bd   :  { %5353 = vmatmul.mubr.msk.f32.gmra.mrb[126].mxu1 %vm477_vm4, %v3957_v27  ;;  %4239 = vmatprep.mubr.f32.mxu0 %v5815_v2 }
 0x9be   :  { %4132 = vmatprep.mubr.f32.mxu1 %v5815_v2 }
 0x9c0   :  { %5363 = vmatmul.mubr.msk.f32.gmra.mrb[140].mxu0 %vm477_vm4, %v3957_v27 }
 0x9c1   :  { %5354 = vmatmul.mubr.msk.f32.gmra.mrb[128].mxu1 %vm477_vm4, %v3958_v52  ;;  %4245 = vmatprep.mubr.f32.mxu0 %v5815_v2 }
 0x9c2   :  { %4138 = vmatprep.mubr.f32.mxu1 %v5815_v2 }
 0x9c4   :  { %5364 = vmatmul.mubr.msk.f32.gmra.mrb[142].mxu0 %vm477_vm4, %v3958_v52 }
 0x9c5   :  { %5355 = vmatmul.mubr.msk.f32.gmra.mrb[130].mxu1 %vm477_vm4, %v3959_v54  ;;  %4251 = vmatprep.mubr.f32.mxu0 %v5815_v2 }
 0x9c6   :  { %4322 = vmatprep.mubr.f32.mxu1 %v5815_v2 }
 0x9c8   :  { %5365 = vmatmul.mubr.msk.f32.gmra.mrb[144].mxu0 %vm477_vm4, %v3959_v54 }
 0x9c9   :  { %5368 = vmatmul.mubr.msk.f32.vlgmr.msra.gmra.mrb[132].mxu1 %vm477_vm4, %v6263_v33  ;;  %4607 = vmatprep.mubr.f32.mxu0 %v5815_v2 }
 0x9ca   :  { %4328 = vmatprep.mubr.f32.mxu1 %v5815_v2 }
 0x9cd   :  { %5369 = vmatmul.mubr.msk.f32.gmra.mrb[134].mxu1 %vm477_vm4, %v3953_v41 }
 0x9ce   :  { %4334 = vmatprep.mubr.f32.mxu1 %v5815_v2 }
 0x9d1   :  { %5370 = vmatmul.mubr.msk.f32.gmra.mrb[136].mxu1 %vm477_vm4, %v3954_v9 }
 0x9d2   :  { %4340 = vmatprep.mubr.f32.mxu1 %v5815_v2 }
 0x9d5   :  { %5371 = vmatmul.mubr.msk.f32.gmra.mrb[138].mxu1 %vm477_vm4, %v3955_v49 }
 0x9d6   :  { %4346 = vmatprep.mubr.f32.mxu1 %v5815_v2 }
 0x9d9   :  { %5372 = vmatmul.mubr.msk.f32.gmra.mrb[140].mxu1 %vm477_vm4, %v3956_v53 }
 0x9da   :  { %4352 = vmatprep.mubr.f32.mxu1 %v5815_v2 }
 0x9dd   :  { %5373 = vmatmul.mubr.msk.f32.gmra.mrb[142].mxu1 %vm477_vm4, %v3957_v27 }
 0x9de   :  { %4358 = vmatprep.mubr.f32.mxu1 %v5815_v2 }
 0x9e1   :  { %5374 = vmatmul.mubr.msk.f32.gmra.mrb[144].mxu1 %vm477_vm4, %v3958_v52 }
 0x9e2   :  { %4364 = vmatprep.mubr.f32.mxu1 %v5815_v2 }
 0x9e5   :  { %5375 = vmatmul.mubr.msk.f32.gmra.mrb[146].mxu1 %vm477_vm4, %v3959_v54 }
 0x9e6   :  { %4749 = vmatprep.mubr.f32.mxu1 %v5815_v2 }
 0xa7c   :  { %v4098_v55 = vpop.f32.mrb[116].mxu1 }
 0xa7d   :  { %v4371_v56 = vmax.f32 %v4098_v55, 0.0  ;;  %v4100_v57 = vpop.f32.mrb[117].mxu1 }
 0xa7e   :  { %v4372_v58 = vmax.f32 %v4100_v57, 0.0 }
 0xa7f   :  { %v4211_v47 = vpop.f32.mrb[130].mxu0 }
 0xa80   :  { %v4104_v59 = vpop.f32.mrb[118].mxu1  ;;  %v4373_v60 = vmax.f32 %v4211_v47, 0.0  ;;  %v4213_v61 = vpop.f32.mrb[131].mxu0 }
 0xa81   :  { %v4377_v62 = vmax.f32 %v4104_v59, 0.0  ;;  %v4106_v63 = vpop.f32.mrb[119].mxu1  ;;  %v4374_v0 = vmax.f32 %v4213_v61, 0.0 }
 0xa82   :  { %v4378_v3 = vmax.f32 %v4106_v63, 0.0 }
 0xa83   :  { %v5654_v4 = vpack.c.bf16 %v4377_v62, %v4371_v56  ;;  %v4217_v5 = vpop.f32.mrb[132].mxu0 }
 0xa84   :  { %v4110_v6 = vpop.f32.mrb[120].mxu1  ;;  %v5652_v7 = vpack.c.bf16 %v4378_v3, %v4372_v58  ;;  %v4379_v10 = vmax.f32 %v4217_v5, 0.0  ;;  %v4219_v11 = vpop.f32.mrb[133].mxu0 }
 0xa85   :  { %v4383_v12 = vmax.f32 %v4110_v6, 0.0  ;;  %v4112_v15 = vpop.f32.mrb[121].mxu1  ;;  %v4380_v16 = vmax.f32 %v4219_v11, 0.0 }
 0xa86   :  { %v4384_v17 = vmax.f32 %v4112_v15, 0.0  ;;  %5653 = vmatprep.subr.bf16.mxu0 %v5652_v7  ;;  %v6321_v18 = vpack.c.bf16 %v4379_v10, %v4373_v60 }
 0xa87   :  { %5655 = vmatpush1.bf16.msra.mxu0 %v5654_v4  ;;  %v4223_v22 = vpop.f32.mrb[134].mxu0  ;;  %v6323_v23 = vpack.c.bf16 %v4380_v16, %v4374_v0 }
 0xa88   :  { %v4116_v24 = vpop.f32.mrb[122].mxu1  ;;  %v4385_v25 = vmax.f32 %v4223_v22, 0.0  ;;  %v4225_v8 = vpop.f32.mrb[135].mxu0 }
 0xa89   :  { %v4389_v29 = vmax.f32 %v4116_v24, 0.0  ;;  %v4118_v30 = vpop.f32.mrb[123].mxu1  ;;  %v4386_v31 = vmax.f32 %v4225_v8, 0.0  ;;  %v4517_v8 = vld [vmem:[#allocation4 + $0x188] sm:$0x1] }
 0xa8a   :  { %v4390_v33 = vmax.f32 %v4118_v30, 0.0 }
 0xa8b   :  { %v5658_v34 = vpack.c.bf16 %v4389_v29, %v4383_v12  ;;  %v4229_v35 = vpop.f32.mrb[136].mxu0 }
 0xa8c   :  { %v4122_v36 = vpop.f32.mrb[124].mxu1  ;;  %v5656_v37 = vpack.c.bf16 %v4390_v33, %v4384_v17  ;;  %v4391_v38 = vmax.f32 %v4229_v35, 0.0  ;;  %v4231_v39 = vpop.f32.mrb[137].mxu0  ;;  %v4516_v35 = vld [vmem:[#allocation4 + $0x180] sm:$0x1] }
 0xa8d   :  { %v4395_v40 = vmax.f32 %v4122_v36, 0.0  ;;  %v4124_v41 = vpop.f32.mrb[125].mxu1  ;;  %v4392_v42 = vmax.f32 %v4231_v39, 0.0 }
 0xa8e   :  { %v4396_v43 = vmax.f32 %v4124_v41, 0.0  ;;  %5657 = vmatprep.subr.bf16.mxu0 %v5656_v37  ;;  %v6325_v44 = vpack.c.bf16 %v4391_v38, %v4385_v25  ;;  %v4467_v38 = vld [vmem:[#allocation8 + $0x188] sm:$0x3] }
 0xa8f   :  { %5659 = vmatpush1.bf16.msra.mxu0 %v5658_v34  ;;  %v4235_v45 = vpop.f32.mrb[138].mxu0  ;;  %v6327_v9 = vpack.c.bf16 %v4392_v42, %v4386_v31 }
 0xa90   :  { %v4128_v46 = vpop.f32.mrb[126].mxu1  ;;  %v4397_v48 = vmax.f32 %v4235_v45, 0.0  ;;  %v4237_v32 = vpop.f32.mrb[139].mxu0 }
 0xa91   :  { %v4401_v49 = vmax.f32 %v4128_v46, 0.0  ;;  %v4130_v50 = vpop.f32.mrb[127].mxu1  ;;  %v4398_v51 = vmax.f32 %v4237_v32, 0.0 }
 0xa92   :  { %v4402_v53 = vmax.f32 %v4130_v50, 0.0 }
 0xa93   :  { %v5662_v27 = vpack.c.bf16 %v4401_v49, %v4395_v40  ;;  %v4241_v52 = vpop.f32.mrb[140].mxu0 }
 0xa94   :  { %v4134_v54 = vpop.f32.mrb[128].mxu1  ;;  %v5660_v55 = vpack.c.bf16 %v4402_v53, %v4396_v43  ;;  %v4403_v56 = vmax.f32 %v4241_v52, 0.0  ;;  %v4243_v57 = vpop.f32.mrb[141].mxu0 }
 0xa95   :  { %v4407_v58 = vmax.f32 %v4134_v54, 0.0  ;;  %v4136_v47 = vpop.f32.mrb[129].mxu1  ;;  %v4404_v59 = vmax.f32 %v4243_v57, 0.0  ;;  %v4519_v54 = vld [vmem:[#allocation4 + $0x198] sm:$0x1] }
 0xa96   :  { %v4408_v60 = vmax.f32 %v4136_v47, 0.0  ;;  %5661 = vmatprep.subr.bf16.mxu0 %v5660_v55  ;;  %v5678_v61 = vpack.c.bf16 %v4403_v56, %v4397_v48 }
 0xa97   :  { %5663 = vmatpush1.bf16.msra.mxu0 %v5662_v27  ;;  %v4247_v62 = vpop.f32.mrb[142].mxu0  ;;  %v5676_v63 = vpack.c.bf16 %v4404_v59, %v4398_v51 }
 0xa98   :  { %v4140_v0 = vpop.f32.mrb[130].mxu1  ;;  %v4409_v3 = vmax.f32 %v4247_v62, 0.0  ;;  %v4249_v4 = vpop.f32.mrb[143].mxu0 }
 0xa99   :  { %v4413_v5 = vmax.f32 %v4140_v0, 0.0  ;;  %v4142_v6 = vpop.f32.mrb[131].mxu1  ;;  %v4410_v7 = vmax.f32 %v4249_v4, 0.0 }
 0xa9a   :  { %v4414_v10 = vmax.f32 %v4142_v6, 0.0 }
 0xa9b   :  { %v5666_v11 = vpack.c.bf16 %v4413_v5, %v4407_v58  ;;  %v4253_v12 = vpop.f32.mrb[144].mxu0 }
 0xa9c   :  { %v4324_v15 = vpop.f32.mrb[132].mxu1  ;;  %v5664_v16 = vpack.c.bf16 %v4414_v10, %v4408_v60  ;;  %v4415_v17 = vmax.f32 %v4253_v12, 0.0  ;;  %v4255_v22 = vpop.f32.mrb[145].mxu0  ;;  %v4520_v10 = vld [vmem:[#allocation4 + $0x1a0] sm:$0x1] }
 0xa9d   :  { %v4375_v24 = vmax.f32 %v4324_v15, 0.0  ;;  %v4326_v25 = vpop.f32.mrb[133].mxu1  ;;  %v4416_v29 = vmax.f32 %v4255_v22, 0.0  ;;  %v4834_v12 = vld [vmem:[#allocation10] sm:$0x1f] }
 0xa9e   :  { %v4376_v30 = vmax.f32 %v4326_v25, 0.0  ;;  %5665 = vmatprep.subr.bf16.mxu0 %v5664_v16  ;;  %v5682_v31 = vpack.c.bf16 %v4415_v17, %v4409_v3 }
 0xa9f   :  { %5667 = vmatpush1.bf16.msra.mxu0 %v5666_v11  ;;  %v5680_v33 = vpack.c.bf16 %v4416_v29, %v4410_v7  ;;  %v4521_v7 = vld [vmem:[#allocation4 + $0x1a8] sm:$0x1]  ;;  %v4835_v11 = vld [vmem:[#allocation10 + $0x8] sm:$0x1f] }
 0xaa0   :  { %v4330_v34 = vpop.f32.mrb[134].mxu1  ;;  %5376 = vmatprep.subr.msk.mxu0 %vm490_vm3, %v4517_v8 }
 0xaa1   :  { %v4381_v36 = vmax.f32 %v4330_v34, 0.0  ;;  %v4332_v37 = vpop.f32.mrb[135].mxu1 }
 0xaa2   :  { %v4382_v39 = vmax.f32 %v4332_v37, 0.0 }
 0xaa3   :  { %5377 = vmatpush1.msk.msra.mxu0 %vm490_vm3, %v4516_v35  ;;  %v5686_v40 = vpack.c.bf16 %v4381_v36, %v4375_v24 }
 0xaa4   :  { %v4336_v41 = vpop.f32.mrb[136].mxu1  ;;  %5378 = vmatmul.mubr.msk.f32.vlgmr.msra.gmra.mrb[146].mxu0 %vm2152_vm5, %v4467_v38  ;;  %5669 = vmatprep.subr.bf16.mxu0 %v6323_v23  ;;  %v5684_v42 = vpack.c.bf16 %v4382_v39, %v4376_v30 }
 0xaa5   :  { %v4387_v43 = vmax.f32 %v4336_v41, 0.0  ;;  %v4338_v45 = vpop.f32.mrb[137].mxu1  ;;  %5671 = vmatpush1.bf16.msra.mxu0 %v6321_v18  ;;  %4678 = vmatprep.mubr.f32.mxu0 %v5815_v2 }
 0xaa6   :  { %v4388_v46 = vmax.f32 %v4338_v45, 0.0  ;;  %5685 = vmatprep.subr.bf16.mxu1 %v5684_v42  ;;  %5673 = vmatprep.subr.bf16.mxu0 %v6327_v9 }
 0xaa7   :  { %5687 = vmatpush1.bf16.msra.mxu1 %v5686_v40 }
 0xaa8   :  { %v4342_v48 = vpop.f32.mrb[138].mxu1 }
 0xaa9   :  { %v4393_v32 = vmax.f32 %v4342_v48, 0.0  ;;  %v4344_v49 = vpop.f32.mrb[139].mxu1  ;;  %5675 = vmatpush1.bf16.msra.mxu0 %v6325_v44  ;;  %v4518_v44 = vld [vmem:[#allocation4 + $0x190] sm:$0x1] }
 0xaaa   :  { %v4394_v50 = vmax.f32 %v4344_v49, 0.0  ;;  %5677 = vmatprep.subr.bf16.mxu0 %v5676_v63 }
 0xaab   :  { %v5690_v23 = vpack.c.bf16 %v4393_v32, %v4387_v43 }
 0xaac   :  { %v4348_v51 = vpop.f32.mrb[140].mxu1  ;;  %v5688_v53 = vpack.c.bf16 %v4394_v50, %v4388_v46  ;;  %v4836_v50 = vld [vmem:[#allocation10 + $0x10] sm:$0x1f] }
 0xaad   :  { %v4399_v27 = vmax.f32 %v4348_v51, 0.0  ;;  %v4350_v52 = vpop.f32.mrb[141].mxu1  ;;  %5679 = vmatpush1.bf16.msra.mxu0 %v5678_v61 }
 0xaae   :  { %v4400_v18 = vmax.f32 %v4350_v52, 0.0  ;;  %5689 = vmatprep.subr.bf16.mxu1 %v5688_v53  ;;  %5681 = vmatprep.subr.bf16.mxu0 %v5680_v33  ;;  %v4814_v52 = vld [vmem:[#allocation8 + $0x1a0] sm:$0x1f] }
 0xaaf   :  { %5691 = vmatpush1.bf16.msra.mxu1 %v5690_v23 }
 0xab0   :  { %v4354_v9 = vpop.f32.mrb[142].mxu1 }
 0xab1   :  { %v4405_v55 = vmax.f32 %v4354_v9, 0.0  ;;  %v4356_v56 = vpop.f32.mrb[143].mxu1  ;;  %5683 = vmatpush1.bf16.msra.mxu0 %v5682_v31 }
 0xab2   :  { %v4406_v57 = vmax.f32 %v4356_v56, 0.0  ;;  %5379 = vmatprep.subr.msk.mxu0 %vm490_vm3, %v4519_v54 }
 0xab3   :  { %v5694_v58 = vpack.c.bf16 %v4405_v55, %v4399_v27  ;;  %v4981_v55 = vld [vmem:[%s6384_s1] sm:$0x3]  ;;  %s5782_s1 = scalar_lea.vmem %s5152_s27, 32 }
 0xab4   :  { %v4360_v47 = vpop.f32.mrb[144].mxu1  ;;  %v5692_v59 = vpack.c.bf16 %v4406_v57, %v4400_v18  ;;  %v4813_v57 = vld [vmem:[#allocation8 + $0x198] sm:$0x1f]  ;;  %v4982_v1 = vmax.f32 %v4981_v55, 0.0  ;;  %p5783_p10 = scmp.ne.s32.totalorder %s5152_s27, %s5782_s1  ;;  %p5788_p12 = scmp.lt.s32.totalorder %s5782_s1, %s5782_s1 }
 0xab5   :  { %v4411_v60 = vmax.f32 %v4360_v47, 0.0  ;;  %v4362_v62 = vpop.f32.mrb[145].mxu1  ;;  %5380 = vmatpush1.msk.msra.mxu0 %vm490_vm3, %v4518_v44  ;;  %v5390_v47 = vld [vmem:[#allocation8 + $0x1a8] ss:$0 sm:$0xff] }
 0xab6   :  { %v4412_v61 = vmax.f32 %v4362_v62, 0.0  ;;  %5381 = vmatmul.mubr.msk.f32.vlgmr.msra.gmra.mrb[148].mxu0 %vm2152_vm5, %v4467_v38  ;;  %5693 = vmatprep.subr.bf16.mxu1 %v5692_v59  ;;  %p5789_p13 = por %p5788_p12, %p5787_p11 }
 0xab7   :  { %5695 = vmatpush1.bf16.msra.mxu1 %v5694_v58  ;;  %4841 = vmatprep.subr.mxu0 %v4835_v11 }
 0xab8   :  { %v4366_v63 = vpop.f32.mrb[146].mxu1  ;;  %p5790_p0 = pnand %p5789_p13, %p5783_p10 }
 0xab9   :  { %v4417_v0 = vmax.f32 %v4366_v63, 0.0  ;;  %v4368_v3 = vpop.f32.mrb[147].mxu1 }
 0xaba   :  { %v4418_v4 = vmax.f32 %v4368_v3, 0.0 }
 0xabb   :  { %v5698_v5 = vpack.c.bf16 %v4417_v0, %v4411_v60 }
 0xabc   :  { %v5696_v6 = vpack.c.bf16 %v4418_v4, %v4412_v61  ;;  %4842 = vmatpush1.xpose.msra.mxu0 %v4834_v12 }
 0xabd   :  { %5397 = vmatprep.subr.mxu0 %v5815_v2 }
 0xabe   :  { %5697 = vmatprep.subr.bf16.mxu1 %v5696_v6 }
 0xabf   :  { %5699 = vmatpush1.bf16.msra.mxu1 %v5698_v5 }
 0xac0   :  { %5382 = vmatprep.subr.msk.mxu1 %vm490_vm3, %v4521_v7 }
 0xac3   :  { %5383 = vmatpush1.msk.msra.mxu1 %vm490_vm3, %v4520_v10 }
 0xac4   :  { %5384 = vmatmul.mubr.msk.f32.vlgmr.msra.gmra.mrb[148].mxu1 %vm2152_vm5, %v4467_v38  ;;  %5402 = vmatprep.subr.mxu1 %v5815_v2 }
 0xac5   :  { %5404 = vmatprep.mubr.msk.f32.mxu1 %vm5819_vm6, %v5815_v2  ;;  %5403 = vmatpush3.msk.msra.mxu1 %vm4988_vm7, %v4814_v52 }
 0xac6   :  { %5407 = vmatprep.subr.mxu1 %v5815_v2 }
 0xb77   :  { %v4609_v15 = vpop.f32.mrb[146].mxu0 }
 0xb78   :  { %v4806_v16 = vadd.f32 %v4609_v15, %v6112_v13  ;;  %v4611_v17 = vpop.f32.mrb[147].mxu0 }
 0xb79   :  { %v4763_v22 = vcombine.low %v4609_v15, %v4611_v17  ;;  %v4807_v24 = vadd.f32 %v4611_v17, %v6114_v14 }
 0xb7a   :  { %v4816_v25 = vmax.f32 %v4806_v16, 0.0 }
 0xb7b   :  { %v4772_v35 = vrot.slane %v4763_v22, %v6119_v19  ;;  %v4817_v39 = vmax.f32 %v4807_v24, 0.0 }
 0xb7c   :  { %v4825_v34 = vrot.slane %v4816_v25, 1 }
 0xb7d   :  { %v4826_v45 = vrot.slane %v4817_v39, 1 }
 0xb89   :  { %v4680_v8 = vpop.f32.mrb[148].mxu0 }
 0xb8a   :  { %v4808_v29 = vadd.f32 %v4680_v8, %v6121_v20  ;;  %v4682_v30 = vpop.f32.mrb[149].mxu0 }
 0xb8b   :  { %v4764_v31 = vcombine.low %v4680_v8, %v4682_v30  ;;  %v4809_v33 = vadd.f32 %v4682_v30, %v6123_v21 }
 0xb8c   :  { %v4818_v40 = vmax.f32 %v4808_v29, 0.0 }
 0xb8d   :  { %v4779_v36 = vrot.slane %v4764_v31, %v6119_v19  ;;  %v4819_v37 = vmax.f32 %v4809_v33, 0.0 }
 0xb8e   :  { %v4827_v46 = vrot.slane %v4818_v40, 1 }
 0xb8f   :  { %v4787_v38 = vcombine.low %v4772_v35, %v4779_v36  ;;  %v4831_v13 = vsel %vm490_vm3, %v4825_v34, %v4819_v37 }
 0xb91   :  { %v4794_v23 = vrot.slane %v4787_v38, %v6119_v19 }
 0xb97   :  { %v4751_v14 = vpop.f32.mrb[148].mxu1 }
 0xb98   :  { %v4810_v41 = vadd.f32 %v4751_v14, %v6129_v26  ;;  %v4753_v42 = vpop.f32.mrb[149].mxu1 }
 0xb99   :  { %v4765_v20 = vcombine.low %v4751_v14, %v4753_v42  ;;  %v4811_v43 = vadd.f32 %v4753_v42, %v6131_v28  ;;  %v4756_v28 = vld [vmem:[#allocation2] ss:$2 sm:$0x3f] }
 0xb9a   :  { %v4820_v21 = vmax.f32 %v4810_v41, 0.0 }
 0xb9b   :  { %v4786_v48 = vrot.slane %v4765_v20, %v6119_v19  ;;  %v4821_v32 = vmax.f32 %v4811_v43, 0.0 }
 0xb9c   :  { %v4832_v49 = vsel %vm490_vm3, %v4826_v45, %v4820_v21 }
 0xb9d   :  { %v4801_v51 = vrot.slane %v4786_v48, %v6119_v19  ;;  %4905 = vmatprep.mubr.f32.mxu0 %v4832_v49  ;;  %v4833_v26 = vsel %vm490_vm3, %v4827_v46, %v4821_v32  ;;  %v5385_v19 = vld [vmem:[#allocation8 + $0x190] ss:$0 sm:$0xff] }
 0xb9e   :  { %4906 = vmatmul.mubr.f32.vlgmr.msra.gmra.mrb[150].mxu0 %v4831_v13 }
 0xb9f   :  { %v4802_v53 = vcombine.low %v4794_v23, %v4801_v51  ;;  %5398 = vmatpush3.xpose.msra.mxu0 %v4836_v50  ;;  %5399 = vmatprep.mubr.msk.f32.mxu0 %vm5819_vm6, %v5815_v2 }
 0xba1   :  { %v4804_v27 = vsub.f32 %v4756_v28, %v4802_v53 }
 0xba3   :  { %4805 = vst.msk [vmem:[#allocation2] ss:$2 sm:$0x3f] %vm5882_vm0, %v4804_v27 }
 0xba6   :  { %5400 = vmatmul.mubr.f32.vlgmr.msra.gmra.mrb[150].mxu0 %v4833_v26 }
 0xc79   :  { %v4977_v18 = vpop.f32.mrb[150].mxu0 }
 0xc7a   :  { %v5700_v54 = vadd.f32 %v5385_v19, %v4977_v18  ;;  %v5401_v9 = vpop.f32.mrb[151].mxu0 }
 0xc7c   :  { %v4983_v56 = vmax.f32 %v5700_v54, 0.0 }
 0xc7e   :  { %5405 = vmatmul.mubr.msk.f32.vlgmr.msra.gmra.mrb[150].mxu1 %vm4984_vm8, %v4983_v56 }
 0xc7f   :  { %5408 = vmatpush3.msk.msra.mxu1 %vm4988_vm7, %v4813_v57  ;;  %5409 = vmatprep.mubr.msk.f32.mxu1 %vm5819_vm6, %v5815_v2 }
 0xc82   :  { %5410 = vmatmul.mubr.msk.f32.vlgmr.msra.gmra.mrb[152].mxu1 %vm4984_vm8, %v4982_v1 }
 0xd51   :  { %v5058_v44 = vpop.f32.mrb[150].mxu1 }
 0xd52   :  { %v5406_v58 = vpop.f32.mrb[151].mxu1 }
 0xd55   :  { %v5134_v59 = vpop.f32.mrb[152].mxu1 }
 0xd56   :  { %v5135_v60 = vadd.f32 %v5134_v59, %v5058_v44  ;;  %v5411_v62 = vpop.f32.mrb[153].mxu1 }
 0xd58   :  { %v5142_v61 = vadd.f32 %v5390_v47, %v5135_v60 }
 0xd5a   :  { %5144 = vst.msk [vmem:[#allocation11] sm:$0x3] %vm5143_vm9, %v5142_v61 }
 0xd5b   :  { %5793 = shalt.err (!%p5790_p0)
}
 0xd5c   :  { %s5794_s30 = scalar_lea.hbm %s6387_s4, 32 }
 0xd5d   :  { %p5795_p1 = scmp.ne.s32.totalorder %s6387_s4, %s5794_s30  ;;  %p5798_p2 = scmp.lt.u32.totalorder %s5794_s30, %s6387_s4 }
 0xd5f   :  { %p5800_p3 = pnand %p5798_p2, %p5795_p1 }
 0xd61   :  { %5803 = shalt.err (!%p5800_p3)
}
 0xd62   :  { %5154 = dma.vmem_to_hbm [thread:$0]  %s5152_s27, 32, %s6387_s4, [#allocation7]  }
 0xd63   :  { %5808 = dma.done.wait [#allocation7], 32  }
 0xd64   :  { %5809 = vsyncadd [#allocation7], 4294967264 }
 0xd65   :  { %5158 = vsyncpa [#allocation6], 1 }
 0xd66   :  { %5159 = vsyncpa [#allocation9], 1 }
 0xd67   :  { %5160 = vsyncpa [#allocation7], 1 }

</bundles_post_ra>
